<compile_context>
chip_gen: v6e
topology: v6e:2x2x1
jax: 0.10.0
libtpu: 0.0.40
codegen_flags: <defaults>
</compile_context>

<pallas_src>
import jax
import jax.numpy as jnp
from jax.experimental import pallas as pl
from jax.experimental.pallas import tpu as pltpu

NUM_NODES = 10     # matches module-level `num_nodes = 10`
HIDDEN1 = 64
HIDDEN2 = 32


def time2graph_kernel(x_ref, m1t_ref, b1_ref, m2t_ref, b2_ref, wfc_ref, bfc_ref,
                      out_ref):
    """One batch block per grid step; three lane-dense 2D MXU matmuls.

    x_ref    : (Bb, N*F)    f32, one sample per sublane row, node-major columns
    m1t_ref  : (N*F, N*64)  bf16, kron(adj^T, W1)
    b1_ref   : (1,  N*64)   f32, b1 tiled per node
    m2t_ref  : (N*64, N*32) bf16, kron(adj^T, W2)
    b2_ref   : (1,  N*32)   f32, b2 tiled per node
    wfc_ref  : (N*32, C)    bf16
    bfc_ref  : (1,  C)      f32
    out_ref  : (Bb, C)      f32
    """
    # GraphConvLayer 1: relu( x @ kron(adj^T, W1) + b1 )
    x = x_ref[...].astype(jnp.bfloat16)
    h1 = jnp.dot(x, m1t_ref[...], preferred_element_type=jnp.float32) + b1_ref[...]
    h1 = jnp.maximum(h1, 0.0)                                         # (Bb, N*64)

    # GraphConvLayer 2: relu( h1 @ kron(adj^T, W2) + b2 )
    h2 = jnp.dot(h1.astype(jnp.bfloat16), m2t_ref[...],
                 preferred_element_type=jnp.float32) + b2_ref[...]
    h2 = jnp.maximum(h2, 0.0)                                         # (Bb, N*32)

    # fc over node-major flattened features.
    out_ref[...] = (jnp.dot(h2.astype(jnp.bfloat16), wfc_ref[...],
                            preferred_element_type=jnp.float32)
                    + bfc_ref[...])                                   # (Bb, C)


def _ceil_div(a, b):
    return -(-a // b)


def time2graph_forward(x, adj, params, *, block_b=None):
    """x: (B, N, F) f32, adj: (N, N) f32 -> logits (B, C) f32."""
    w1, b1, w2, b2, wfc, bfc = params
    B, N, F = x.shape
    C = bfc.shape[-1]
    NF, NH1, NH2 = N * F, N * HIDDEN1, N * HIDDEN2

    # --- batch block size: big blocks for MXU reuse, >=2 blocks when B allows -
    if block_b is None:
        groups = _ceil_div(B, 128)              # batch in units of 128 rows
        tgt = min(16, groups)                   # <= 2048 rows/block (v7x-safe VMEM)
        if groups >= 2:                         # give both v7x TCs a block to run
            tgt = min(tgt, _ceil_div(groups, 2))
        block_b = 128 * max(1, tgt)
    assert block_b % 128 == 0, "batch block must be a multiple of 128 rows"
    n_blocks = _ceil_div(B, block_b)
    b_pad = n_blocks * block_b

    # --- layout / weight prep (one-time, tiny XLA ops; no transpose of x) -----
    x_rows = x.reshape(B, NF)                   # free row-major reshape
    if b_pad != B:
        x_rows = jnp.pad(x_rows, ((0, b_pad - B), (0, 0)))

    # Kronecker mixed product:  (adj-mix then Linear) == matmul by kron(adj^T, W)
    m1t = jnp.kron(adj.T, w1).astype(jnp.bfloat16)          # (N*F,  N*64)
    m2t = jnp.kron(adj.T, w2).astype(jnp.bfloat16)          # (N*64, N*32)
    wfc_bf = wfc.astype(jnp.bfloat16)                       # (N*32, C)
    b1r = jnp.tile(b1.reshape(1, HIDDEN1), (1, N)).astype(jnp.float32)   # (1, N*64)
    b2r = jnp.tile(b2.reshape(1, HIDDEN2), (1, N)).astype(jnp.float32)   # (1, N*32)
    bfcr = bfc.reshape(1, C).astype(jnp.float32)                         # (1, C)

    grid_spec = pltpu.PrefetchScalarGridSpec(
        num_scalar_prefetch=0,
        grid=(n_blocks,),
        in_specs=[
            pl.BlockSpec((block_b, NF), lambda i: (i, 0)),   # x block (batch rows)
            pl.BlockSpec((NF, NH1), lambda i: (0, 0)),       # kron(adj^T, W1) bf16
            pl.BlockSpec((1, NH1), lambda i: (0, 0)),        # b1 tiled
            pl.BlockSpec((NH1, NH2), lambda i: (0, 0)),      # kron(adj^T, W2) bf16
            pl.BlockSpec((1, NH2), lambda i: (0, 0)),        # b2 tiled
            pl.BlockSpec((NH2, C), lambda i: (0, 0)),        # Wfc bf16
            pl.BlockSpec((1, C), lambda i: (0, 0)),          # bfc
        ],
        out_specs=pl.BlockSpec((block_b, C), lambda i: (i, 0)),
    )

    # VMEM budget: double-buffered x/out blocks + h1/h2 f32 temps + bf16 casts
    # + (double-buffered) weights, with ~50% headroom.  Clamp to [32, 56] MiB so
    # v5e's 16 MiB scoped default is raised and v7x's 64 MiB physical is safe.
    per_row = (2 * NF * 4 + 2 * C * 4
               + (NH1 + NH2) * 4
               + (NF + NH1 + NH2) * 2)
    weight_bytes = 2 * ((NF * NH1 + NH1 * NH2 + NH2 * C) * 2
                        + (NH1 + NH2 + C) * 4)
    vmem_limit = int(1.5 * (block_b * per_row + weight_bytes))
    vmem_limit = min(max(vmem_limit, 32 << 20), 56 << 20)

    out_rows = pl.pallas_call(
        time2graph_kernel,
        out_shape=jax.ShapeDtypeStruct((b_pad, C), jnp.float32),
        grid_spec=grid_spec,
        compiler_params=pltpu.CompilerParams(
            dimension_semantics=("parallel",),   # v7x: shard batch blocks over 2 TCs
            vmem_limit_bytes=vmem_limit),
    )(x_rows, m1t, b1r, m2t, b2r, wfc_bf, bfcr)

    return out_rows[:B]                                      # (B, C), no transpose


def reference_forward(x, adj, params):
    """Pure-JAX f32 reference mirroring the PyTorch module."""
    w1, b1, w2, b2, wfc, bfc = params
    B, N, _ = x.shape
    h = jnp.maximum(jnp.einsum('ij,bjf->bif', adj, x) @ w1 + b1, 0.0)
    h = jnp.maximum(jnp.einsum('ij,bjf->bif', adj, h) @ w2 + b2, 0.0)
    return h.reshape(B, HIDDEN2 * N) @ wfc + bfc


if __name__ == "__main__":
    B, N, F, C = 2, NUM_NODES, 8, 4      # batch, num_nodes, num_features, num_classes

    key = jax.random.PRNGKey(0)
    keys = jax.random.split(key, 8)

    x = jax.random.normal(keys[0], (B, N, F), dtype=jnp.float32)
    # Deterministic synthetic adjacency (random sparse + self loops).
    adj = (jax.random.uniform(keys[1], (N, N)) < 0.3).astype(jnp.float32)
    adj = adj + jnp.eye(N, dtype=jnp.float32)

    # Deterministic parameter init (shapes from Time2Graph.__init__).
    w1 = 0.1 * jax.random.normal(keys[2], (F, HIDDEN1), dtype=jnp.float32)
    b1 = 0.1 * jax.random.normal(keys[3], (1, HIDDEN1), dtype=jnp.float32)
    w2 = 0.1 * jax.random.normal(keys[4], (HIDDEN1, HIDDEN2), dtype=jnp.float32)
    b2 = 0.1 * jax.random.normal(keys[5], (1, HIDDEN2), dtype=jnp.float32)
    wfc = 0.1 * jax.random.normal(keys[6], (HIDDEN2 * N, C), dtype=jnp.float32)
    bfc = 0.1 * jax.random.normal(keys[7], (1, C), dtype=jnp.float32)

    params = (w1, b1, w2, b2, wfc, bfc)

    # Small-batch check (single grid block).
    out = jax.block_until_ready(time2graph_forward(x, adj, params))
    ref = reference_forward(x, adj, params)
    assert out.shape == (B, C), out.shape
    # bf16 MXU operands (f32 accumulation) -> loosened tolerance vs f32 reference.
    assert jnp.allclose(out, ref, atol=5e-2, rtol=5e-2), (out, ref)

    # Multi-block check: batch not a multiple of the block (exercises padding
    # and >=2 grid blocks for the megacore-parallel axis).
    B2 = 300
    x2 = jax.random.normal(keys[0], (B2, N, F), dtype=jnp.float32)
    out2 = jax.block_until_ready(time2graph_forward(x2, adj, params))
    ref2 = reference_forward(x2, adj, params)
    assert out2.shape == (B2, C), out2.shape
    assert jnp.allclose(out2, ref2, atol=5e-2, rtol=5e-2)

    print("KERNEL_OK")
</pallas_src>

<mosaic_0001>
module attributes {stable_mosaic.version = 11 : i64} {
  func.func @time2graph_kernel(%arg0: i32, %arg1: memref<128x80xf32, #tpu.memory_space<vmem>>, %arg2: memref<80x640xbf16, #tpu.memory_space<vmem>>, %arg3: memref<1x640xf32, #tpu.memory_space<vmem>>, %arg4: memref<640x320xbf16, #tpu.memory_space<vmem>>, %arg5: memref<1x320xf32, #tpu.memory_space<vmem>>, %arg6: memref<320x4xbf16, #tpu.memory_space<vmem>>, %arg7: memref<1x4xf32, #tpu.memory_space<vmem>>, %arg8: memref<128x4xf32, #tpu.memory_space<vmem>>) attributes {dimension_semantics = [#tpu.dimension_semantics<parallel>], iteration_bounds = array<i64: 1>, scalar_prefetch = 0 : i64, scratch_operands = 0 : i64, tpu.core_type = #tpu.core_type<tc>, window_params = [{transform_indices = @transform_0, window_bounds = array<i64: 128, 80>}, {pipeline_mode = #tpu.pipeline_mode<synchronous>, transform_indices = @transform_1, window_bounds = array<i64: 80, 640>}, {pipeline_mode = #tpu.pipeline_mode<synchronous>, transform_indices = @transform_2, window_bounds = array<i64: 1, 640>}, {pipeline_mode = #tpu.pipeline_mode<synchronous>, transform_indices = @transform_3, window_bounds = array<i64: 640, 320>}, {pipeline_mode = #tpu.pipeline_mode<synchronous>, transform_indices = @transform_4, window_bounds = array<i64: 1, 320>}, {pipeline_mode = #tpu.pipeline_mode<synchronous>, transform_indices = @transform_5, window_bounds = array<i64: 320, 4>}, {pipeline_mode = #tpu.pipeline_mode<synchronous>, transform_indices = @transform_6, window_bounds = array<i64: 1, 4>}, {transform_indices = @transform_7, window_bounds = array<i64: 128, 4>}]} {
    %c0 = arith.constant 0 : index
    %c0_0 = arith.constant 0 : index
    %0 = vector.load %arg1[%c0, %c0_0] : memref<128x80xf32, #tpu.memory_space<vmem>>, vector<128x80xf32>
    %1 = arith.truncf %0 : vector<128x80xf32> to vector<128x80xbf16>
    %c0_1 = arith.constant 0 : index
    %c0_2 = arith.constant 0 : index
    %2 = vector.load %arg2[%c0_1, %c0_2] : memref<80x640xbf16, #tpu.memory_space<vmem>>, vector<80x640xbf16>
    %cst = arith.constant dense<0.000000e+00> : vector<128x640xf32>
    %3 = tpu.matmul %1, %2, %cst {dimension_numbers = #tpu.dot_dimension_numbers<[1], [0], [0], [1], [0, 0, 1, 1], [], []>} : vector<128x80xbf16>, vector<80x640xbf16>, vector<128x640xf32> -> vector<128x640xf32>
    %c0_3 = arith.constant 0 : index
    %c0_4 = arith.constant 0 : index
    %4 = vector.load %arg3[%c0_3, %c0_4] : memref<1x640xf32, #tpu.memory_space<vmem>>, vector<1x640xf32>
    %5 = vector.broadcast %4 : vector<1x640xf32> to vector<128x640xf32>
    %6 = arith.addf %3, %5 : vector<128x640xf32>
    %cst_5 = arith.constant 0.000000e+00 : f32
    %7 = vector.broadcast %cst_5 : f32 to vector<128x640xf32>
    %8 = arith.maximumf %6, %7 : vector<128x640xf32>
    %9 = arith.truncf %8 : vector<128x640xf32> to vector<128x640xbf16>
    %c0_6 = arith.constant 0 : index
    %c0_7 = arith.constant 0 : index
    %10 = vector.load %arg4[%c0_6, %c0_7] : memref<640x320xbf16, #tpu.memory_space<vmem>>, vector<640x320xbf16>
    %cst_8 = arith.constant dense<0.000000e+00> : vector<128x320xf32>
    %11 = tpu.matmul %9, %10, %cst_8 {dimension_numbers = #tpu.dot_dimension_numbers<[1], [0], [0], [1], [0, 0, 1, 1], [], []>} : vector<128x640xbf16>, vector<640x320xbf16>, vector<128x320xf32> -> vector<128x320xf32>
    %c0_9 = arith.constant 0 : index
    %c0_10 = arith.constant 0 : index
    %12 = vector.load %arg5[%c0_9, %c0_10] : memref<1x320xf32, #tpu.memory_space<vmem>>, vector<1x320xf32>
    %13 = vector.broadcast %12 : vector<1x320xf32> to vector<128x320xf32>
    %14 = arith.addf %11, %13 : vector<128x320xf32>
    %cst_11 = arith.constant 0.000000e+00 : f32
    %15 = vector.broadcast %cst_11 : f32 to vector<128x320xf32>
    %16 = arith.maximumf %14, %15 : vector<128x320xf32>
    %17 = arith.truncf %16 : vector<128x320xf32> to vector<128x320xbf16>
    %c0_12 = arith.constant 0 : index
    %c0_13 = arith.constant 0 : index
    %18 = vector.load %arg6[%c0_12, %c0_13] : memref<320x4xbf16, #tpu.memory_space<vmem>>, vector<320x4xbf16>
    %cst_14 = arith.constant dense<0.000000e+00> : vector<128x4xf32>
    %19 = tpu.matmul %17, %18, %cst_14 {dimension_numbers = #tpu.dot_dimension_numbers<[1], [0], [0], [1], [0, 0, 1, 1], [], []>} : vector<128x320xbf16>, vector<320x4xbf16>, vector<128x4xf32> -> vector<128x4xf32>
    %c0_15 = arith.constant 0 : index
    %c0_16 = arith.constant 0 : index
    %20 = vector.load %arg7[%c0_15, %c0_16] : memref<1x4xf32, #tpu.memory_space<vmem>>, vector<1x4xf32>
    %21 = vector.broadcast %20 : vector<1x4xf32> to vector<128x4xf32>
    %22 = arith.addf %19, %21 : vector<128x4xf32>
    %c0_17 = arith.constant 0 : index
    %c0_18 = arith.constant 0 : index
    %23 = vector.load %arg8[%c0_17, %c0_18] : memref<128x4xf32, #tpu.memory_space<vmem>>, vector<128x4xf32>
    tpu.vector_store %arg8[%c0_17, %c0_18], %22 {strides = array<i32>} : memref<128x4xf32, #tpu.memory_space<vmem>>, vector<128x4xf32>,
    return
  }
  func.func @transform_0(%arg0: i32) -> (i32, i32) {
    %c0_i32 = arith.constant 0 : i32
    %c0_i32_0 = arith.constant 0 : i32
    return %arg0, %c0_i32 : i32, i32
  }
  func.func @transform_1(%arg0: i32) -> (i32, i32) {
    %c0_i32 = arith.constant 0 : i32
    %c0_i32_0 = arith.constant 0 : i32
    %c0_i32_1 = arith.constant 0 : i32
    return %c0_i32, %c0_i32_0 : i32, i32
  }
  func.func @transform_2(%arg0: i32) -> (i32, i32) {
    %c0_i32 = arith.constant 0 : i32
    %c0_i32_0 = arith.constant 0 : i32
    %c0_i32_1 = arith.constant 0 : i32
    return %c0_i32, %c0_i32_0 : i32, i32
  }
  func.func @transform_3(%arg0: i32) -> (i32, i32) {
    %c0_i32 = arith.constant 0 : i32
    %c0_i32_0 = arith.constant 0 : i32
    %c0_i32_1 = arith.constant 0 : i32
    return %c0_i32, %c0_i32_0 : i32, i32
  }
  func.func @transform_4(%arg0: i32) -> (i32, i32) {
    %c0_i32 = arith.constant 0 : i32
    %c0_i32_0 = arith.constant 0 : i32
    %c0_i32_1 = arith.constant 0 : i32
    return %c0_i32, %c0_i32_0 : i32, i32
  }
  func.func @transform_5(%arg0: i32) -> (i32, i32) {
    %c0_i32 = arith.constant 0 : i32
    %c0_i32_0 = arith.constant 0 : i32
    %c0_i32_1 = arith.constant 0 : i32
    return %c0_i32, %c0_i32_0 : i32, i32
  }
  func.func @transform_6(%arg0: i32) -> (i32, i32) {
    %c0_i32 = arith.constant 0 : i32
    %c0_i32_0 = arith.constant 0 : i32
    %c0_i32_1 = arith.constant 0 : i32
    return %c0_i32, %c0_i32_0 : i32, i32
  }
  func.func @transform_7(%arg0: i32) -> (i32, i32) {
    %c0_i32 = arith.constant 0 : i32
    %c0_i32_0 = arith.constant 0 : i32
    return %arg0, %c0_i32 : i32, i32
  }
}

</mosaic_0001>

<bundles_post_ra>
// kernel: tpu_custom_call.1
= control target key start
LH: loop header
LB: loop body
LE: loop exit
PB: predicated region body
PF: predicated region fallthrough
CT: control target
= control target key end

     0   :  { %v3361_v1 = vmov 0   ;;  %vm238_vm0 = vcmask 654336   ;;  %vm2392_vm1 = vcmask 523264   ;;  %vm2611_vm2 = vcmask 31744   ;;  %s4712_s1 = inlined_call_operand.vmem [shape: bf16[80,640], index: 1, kind: input, shape index: {}]   ;;  %s4713_s0 = inlined_call_operand.vmem [shape: f32[128,80], index: 0, kind: input, shape index: {}]   ;;  %s4714_s3 = inlined_call_operand.vmem [shape: bf16[640,320], index: 3, kind: input, shape index: {}]   ;;  %s4715_s2 = inlined_call_operand.vmem [shape: f32[1,640], index: 2, kind: input, shape index: {}]   ;;  %s4716_s5 = inlined_call_operand.vmem [shape: bf16[320,4], index: 5, kind: input, shape index: {}]   ;;  %s4717_s4 = inlined_call_operand.vmem [shape: f32[1,320], index: 4, kind: input, shape index: {}]   ;;  %s4718_s6 = inlined_call_operand.vmem [shape: f32[1,4], index: 6, kind: input, shape index: {}]   ;;  %s4719_s7 = inlined_call_operand.vmem [shape: f32[128,4], index: 7, kind: output, shape index: {}]  }
   0x1   :  { %v3146_v0 = vld [vmem:[%s4712_s1 + $0xa4] ss:$20 sps:$4 sm:$0xff]   ;;  %295 = vmatprep.mubr.bf16.mxu0 %v3361_v1  ;;  %408 = vmatprep.mubr.bf16.mxu1 %v3361_v1  ;;  %v3148_v2 = vld [vmem:[%s4712_s1 + $0xac] ss:$20 sps:$4 sm:$0xff]   ;;  %v3151_v4 = vld [vmem:[%s4712_s1 + $0xa8] ss:$20 sps:$4 sm:$0xff]  }
   0x2   :  { %269 = vmatprep.subr.bf16.mxu0 %v3146_v0  ;;  %v3150_v3 = vld [vmem:[%s4712_s1 + $0xa0] ss:$20 sps:$4 sm:$0xff]   ;;  %382 = vmatprep.subr.bf16.mxu1 %v3148_v2  ;;  %v3152_v5 = vld [vmem:[%s4712_s1 + $0x7c] ss:$20 sps:$4 sm:$0xff]   ;;  %v3154_v6 = vld [vmem:[%s4712_s1 + $0x84] ss:$20 sps:$4 sm:$0xff]  }
   0x3   :  { %270 = vmatpush1.bf16.msra.mxu0 %v3150_v3  ;;  %383 = vmatpush1.bf16.msra.mxu1 %v3151_v4  ;;  %v3156_v7 = vld [vmem:[%s4712_s1 + $0x78] ss:$20 sps:$4 sm:$0xff]   ;;  %v3157_v8 = vld [vmem:[%s4712_s1 + $0x80] ss:$20 sps:$4 sm:$0xff]   ;;  %v3160_v10 = vld [vmem:[%s4712_s1 + $0x5c] ss:$20 sps:$4 sm:$0xff]  }
   0x4   :  { %271 = vmatprep.subr.bf16.mxu0 %v3152_v5  ;;  %384 = vmatprep.subr.bf16.mxu1 %v3154_v6  ;;  %v3158_v9 = vld [vmem:[%s4712_s1 + $0x54] ss:$20 sps:$4 sm:$0xff]   ;;  %v3162_v11 = vld [vmem:[%s4712_s1 + $0x50] ss:$20 sps:$4 sm:$0xff]   ;;  %v3163_v12 = vld [vmem:[%s4712_s1 + $0x58] ss:$20 sps:$4 sm:$0xff]  }
   0x5   :  { %v3164_v13 = vld [vmem:[%s4712_s1 + $0x2c] ss:$20 sps:$4 sm:$0xff]   ;;  %v3166_v14 = vld [vmem:[%s4712_s1 + $0x34] ss:$20 sps:$4 sm:$0xff]   ;;  %v3169_v16 = vld [vmem:[%s4712_s1 + $0x30] ss:$20 sps:$4 sm:$0xff]  }
   0x6   :  { %v3168_v15 = vld [vmem:[%s4712_s1 + $0x28] ss:$20 sps:$4 sm:$0xff]   ;;  %v3170_v17 = vld [vmem:[%s4712_s1 + $0x4] ss:$20 sps:$4 sm:$0xff]   ;;  %v3172_v18 = vld [vmem:[%s4712_s1 + $0xc] ss:$20 sps:$4 sm:$0xff]  }
   0x7   :  { %272 = vmatpush1.bf16.msra.mxu0 %v3156_v7  ;;  %385 = vmatpush1.bf16.msra.mxu1 %v3157_v8  ;;  %v3174_v19 = vld [vmem:[%s4712_s1] ss:$20 sps:$4 sm:$0xff]   ;;  %v3175_v20 = vld [vmem:[%s4712_s1 + $0x8] ss:$20 sps:$4 sm:$0xff]   ;;  %v3176_v23 = vld [vmem:[%s4712_s1 + $0xb0] ss:$20 sps:$4 sm:$0xff]  }
   0x8   :  { %273 = vmatprep.subr.bf16.mxu0 %v3158_v9  ;;  %386 = vmatprep.subr.bf16.mxu1 %v3160_v10  ;;  %v27_v21 = vld [vmem:[%s4713_s0] sm:$0xff]  ;;  %v28_v22 = vld [vmem:[%s4713_s0 + $0x8] sm:$0xff]  ;;  %v29_v26 = vld [vmem:[%s4713_s0 + $0x10] sm:$0xff] }
   0x9   :  { %v3473_v24 = vpack.c.bf16 %v28_v22, %v27_v21  ;;  %v3177_v25 = vld [vmem:[%s4712_s1 + $0x88] ss:$20 sps:$4 sm:$0xff]   ;;  %v3183_v29 = vld [vmem:[%s4714_s3 + $0xac] ss:$12 sps:$4 sm:$0xff]   ;;  %v3178_v30 = vld [vmem:[%s4712_s1 + $0x60] ss:$20 sps:$4 sm:$0xff]  }
   0xa   :  { %v30_v27 = vld [vmem:[%s4713_s0 + $0x18] sm:$0xff]  ;;  %v3181_v28 = vld [vmem:[%s4714_s3 + $0xa8] ss:$12 sps:$4 sm:$0xff]   ;;  %v31_v36 = vld [vmem:[%s4713_s0 + $0x20] sm:$0xff] }
   0xb   :  { %274 = vmatpush1.bf16.msra.mxu0 %v3162_v11  ;;  %387 = vmatpush1.bf16.msra.mxu1 %v3163_v12  ;;  %v3499_v31 = vpack.c.bf16 %v30_v27, %v29_v26  ;;  %v3189_v32 = vld [vmem:[%s4714_s3 + $0x94] ss:$12 sps:$4 sm:$0xff]   ;;  %v3179_v33 = vld [vmem:[%s4712_s1 + $0x38] ss:$20 sps:$4 sm:$0xff]   ;;  %v3187_v34 = vld [vmem:[%s4714_s3 + $0x90] ss:$12 sps:$4 sm:$0xff]  }
   0xc   :  { %275 = vmatprep.subr.bf16.mxu0 %v3164_v13  ;;  %388 = vmatprep.subr.bf16.mxu1 %v3166_v14  ;;  %v3195_v35 = vld [vmem:[%s4714_s3 + $0x7c] ss:$12 sps:$4 sm:$0xff]   ;;  %v3180_v38 = vld [vmem:[%s4712_s1 + $0x10] ss:$20 sps:$4 sm:$0xff]   ;;  %v3186_v42 = vld [vmem:[%s4714_s3 + $0x22c] ss:$12 sps:$4 sm:$0xff]  }
   0xd   :  { %v32_v37 = vld [vmem:[%s4713_s0 + $0x28] sm:$0xff]  ;;  %v3193_v39 = vld [vmem:[%s4714_s3 + $0x78] ss:$12 sps:$4 sm:$0xff]   ;;  %v33_v45 = vld [vmem:[%s4713_s0 + $0x30] sm:$0xff] }
   0xe   :  { %v3201_v40 = vld [vmem:[%s4714_s3 + $0x64] ss:$12 sps:$4 sm:$0xff]   ;;  %v3534_v41 = vpack.c.bf16 %v32_v37, %v31_v36  ;;  %v3199_v43 = vld [vmem:[%s4714_s3 + $0x60] ss:$12 sps:$4 sm:$0xff]   ;;  %v34_v46 = vld [vmem:[%s4713_s0 + $0x38] sm:$0xff] }
   0xf   :  { %276 = vmatpush1.bf16.msra.mxu0 %v3168_v15  ;;  %389 = vmatpush1.bf16.msra.mxu1 %v3169_v16  ;;  %v3207_v44 = vld [vmem:[%s4714_s3 + $0x4c] ss:$12 sps:$4 sm:$0xff]   ;;  %v3205_v47 = vld [vmem:[%s4714_s3 + $0x48] ss:$12 sps:$4 sm:$0xff]   ;;  %v3563_v49 = vpack.c.bf16 %v34_v46, %v33_v45  ;;  %v3211_v50 = vld [vmem:[%s4714_s3 + $0x30] ss:$12 sps:$4 sm:$0xff]  }
  0x10   :  { %277 = vmatprep.subr.bf16.mxu0 %v3170_v17  ;;  %390 = vmatprep.subr.bf16.mxu1 %v3172_v18  ;;  %v3213_v48 = vld [vmem:[%s4714_s3 + $0x34] ss:$12 sps:$4 sm:$0xff]   ;;  %v3219_v51 = vld [vmem:[%s4714_s3 + $0x1c] ss:$12 sps:$4 sm:$0xff]   ;;  %v3217_v54 = vld [vmem:[%s4714_s3 + $0x18] ss:$12 sps:$4 sm:$0xff]  }
  0x11   :  { %v35_v52 = vld [vmem:[%s4713_s0 + $0x40] sm:$0xff]  ;;  %v36_v53 = vld [vmem:[%s4713_s0 + $0x48] sm:$0xff]  ;;  %v37_v59 = vld [vmem:[%s4713_s0 + $0x50] sm:$0xff] }
  0x12   :  { %v3225_v55 = vld [vmem:[%s4714_s3 + $0x4] ss:$12 sps:$4 sm:$0xff]   ;;  %v3589_v56 = vpack.c.bf16 %v36_v53, %v35_v52  ;;  %v3223_v57 = vld [vmem:[%s4714_s3] ss:$12 sps:$4 sm:$0xff]   ;;  %v38_v60 = vld [vmem:[%s4713_s0 + $0x58] sm:$0xff]  ;;  %v83_v53 = vlaneseq }
  0x13   :  { %278 = vmatpush1.bf16.msra.mxu0 %v3174_v19  ;;  %391 = vmatpush1.bf16.msra.mxu1 %v3175_v20  ;;  %v3231_v58 = vld [vmem:[%s4714_s3 + $0x16c] ss:$12 sps:$4 sm:$0xff]   ;;  %v3229_v61 = vld [vmem:[%s4714_s3 + $0x168] ss:$12 sps:$4 sm:$0xff]   ;;  %v3615_v63 = vpack.c.bf16 %v38_v60, %v37_v59  ;;  %v3235_v0 = vld [vmem:[%s4714_s3 + $0x150] ss:$12 sps:$4 sm:$0xff]  }
  0x14   :  { %3063 = vmatprep.subr.bf16.mxu0 %v3176_v23  ;;  %1523 = vmatprep.subr.bf16.mxu1 %v3183_v29  ;;  %v3237_v62 = vld [vmem:[%s4714_s3 + $0x154] ss:$12 sps:$4 sm:$0xff]   ;;  %v3243_v2 = vld [vmem:[%s4714_s3 + $0x13c] ss:$12 sps:$4 sm:$0xff]   ;;  %v3241_v5 = vld [vmem:[%s4714_s3 + $0x138] ss:$12 sps:$4 sm:$0xff]  }
  0x15   :  { %v39_v3 = vld [vmem:[%s4713_s0 + $0x60] sm:$0xff]  ;;  %v40_v4 = vld [vmem:[%s4713_s0 + $0x68] sm:$0xff]  ;;  %v41_v10 = vld [vmem:[%s4713_s0 + $0x70] sm:$0xff] }
  0x16   :  { %2657 = vmatmul.mubr.msk.bf16.vlgmr.msra.gmra.mxu0 %vm238_vm0, %v3473_v24  ;;  %2665 = vmatmul.mubr.msk.bf16.vlgmr.msra.gmra.mxu1 %vm238_vm0, %v3473_v24  ;;  %v3249_v6 = vld [vmem:[%s4714_s3 + $0x124] ss:$12 sps:$4 sm:$0xff]   ;;  %v49_v7 = vpack.c.bf16 %v40_v4, %v39_v3  ;;  %v3247_v8 = vld [vmem:[%s4714_s3 + $0x120] ss:$12 sps:$4 sm:$0xff]   ;;  %v42_v11 = vld [vmem:[%s4713_s0 + $0x78] sm:$0xff] }
  0x17   :  { %3064 = vmatpush3.bf16.msra.mxu0 %v3176_v23  ;;  %305 = vmatprep.mubr.bf16.mxu0 %v3361_v1  ;;  %v3255_v9 = vld [vmem:[%s4714_s3 + $0x10c] ss:$12 sps:$4 sm:$0xff]   ;;  %v3253_v12 = vld [vmem:[%s4714_s3 + $0x108] ss:$12 sps:$4 sm:$0xff]   ;;  %v50_v13 = vpack.c.bf16 %v42_v11, %v41_v10  ;;  %v3190_v16 = vld [vmem:[%s4714_s3 + $0x210] ss:$12 sps:$4 sm:$0xff]  }
  0x18   :  { %418 = vmatprep.mubr.bf16.mxu1 %v3361_v1  ;;  %3065 = vmatprep.subr.bf16.mxu0 %v3177_v25  ;;  %v3184_v14 = vld [vmem:[%s4714_s3 + $0x228] ss:$12 sps:$4 sm:$0xff]   ;;  %v3259_v19 = vld [vmem:[%s4714_s3 + $0xf0] ss:$12 sps:$4 sm:$0xff]   ;;  %v3196_v20 = vld [vmem:[%s4714_s3 + $0x1f8] ss:$12 sps:$4 sm:$0xff]  }
  0x19   :  { %1524 = vmatpush1.bf16.msra.mxu1 %v3181_v28  ;;  %v3192_v15 = vld [vmem:[%s4714_s3 + $0x214] ss:$12 sps:$4 sm:$0xff]   ;;  %v3198_v18 = vld [vmem:[%s4714_s3 + $0x1fc] ss:$12 sps:$4 sm:$0xff]   ;;  %v3204_v22 = vld [vmem:[%s4714_s3 + $0x1e4] ss:$12 sps:$4 sm:$0xff]  }
  0x1a   :  { %1525 = vmatprep.subr.bf16.mxu1 %v3189_v32  ;;  %v3261_v17 = vld [vmem:[%s4714_s3 + $0xf4] ss:$12 sps:$4 sm:$0xff]   ;;  %v3267_v21 = vld [vmem:[%s4714_s3 + $0xdc] ss:$12 sps:$4 sm:$0xff]   ;;  %v3265_v23 = vld [vmem:[%s4714_s3 + $0xd8] ss:$12 sps:$4 sm:$0xff]  }
  0x1b   :  { %3066 = vmatpush3.bf16.msra.mxu0 %v3177_v25  ;;  %v3273_v25 = vld [vmem:[%s4714_s3 + $0xc4] ss:$12 sps:$4 sm:$0xff]   ;;  %v3210_v26 = vld [vmem:[%s4714_s3 + $0x1cc] ss:$12 sps:$4 sm:$0xff]   ;;  %v3208_v28 = vld [vmem:[%s4714_s3 + $0x1c8] ss:$12 sps:$4 sm:$0xff]  }
  0x1c   :  { %3067 = vmatprep.subr.bf16.mxu0 %v3178_v30  ;;  %v3271_v27 = vld [vmem:[%s4714_s3 + $0xc0] ss:$12 sps:$4 sm:$0xff]   ;;  %v3222_v32 = vld [vmem:[%s4714_s3 + $0x19c] ss:$12 sps:$4 sm:$0xff]  }
  0x1d   :  { %1526 = vmatpush1.bf16.msra.mxu1 %v3187_v34  ;;  %v3216_v29 = vld [vmem:[%s4714_s3 + $0x1b4] ss:$12 sps:$4 sm:$0xff]   ;;  %v3228_v34 = vld [vmem:[%s4714_s3 + $0x184] ss:$12 sps:$4 sm:$0xff]   ;;  %v3234_v36 = vld [vmem:[%s4714_s3 + $0x2ec] ss:$12 sps:$4 sm:$0xff]  }
  0x1e   :  { %2658 = vmatmul.mubr.msk.bf16.gmra.mxu0 %vm238_vm0, %v3499_v31  ;;  %2666 = vmatmul.mubr.msk.bf16.gmra.mxu1 %vm238_vm0, %v3499_v31  ;;  %v3232_v37 = vld [vmem:[%s4714_s3 + $0x2e8] ss:$12 sps:$4 sm:$0xff]   ;;  %v3292_v52 = vld [vmem:[%s4714_s3 + $0x170] ss:$12 sps:$4 sm:$0xff]  }
  0x1f   :  { %315 = vmatprep.mubr.bf16.mxu0 %v3361_v1  ;;  %428 = vmatprep.mubr.bf16.mxu1 %v3361_v1  ;;  %v3256_v45 = vld [vmem:[%s4714_s3 + $0x288] ss:$12 sps:$4 sm:$0xff]  }
  0x20   :  { %3068 = vmatpush3.bf16.msra.mxu0 %v3178_v30  ;;  %1527 = vmatprep.subr.bf16.mxu1 %v3195_v35  ;;  %v3214_v30 = vld [vmem:[%s4714_s3 + $0x1b0] ss:$12 sps:$4 sm:$0xff]   ;;  %v3226_v35 = vld [vmem:[%s4714_s3 + $0x180] ss:$12 sps:$4 sm:$0xff]  }
  0x21   :  { %3069 = vmatprep.subr.bf16.mxu0 %v3179_v33  ;;  %1528 = vmatpush1.bf16.msra.mxu1 %v3193_v39  ;;  %v3238_v39 = vld [vmem:[%s4714_s3 + $0x2d0] ss:$12 sps:$4 sm:$0xff]   ;;  %v3264_v46 = vld [vmem:[%s4714_s3 + $0x274] ss:$12 sps:$4 sm:$0xff]  }
  0x22   :  { %1529 = vmatprep.subr.bf16.mxu1 %v3201_v40  ;;  %v3246_v40 = vld [vmem:[%s4714_s3 + $0x2bc] ss:$12 sps:$4 sm:$0xff]  }
  0x24   :  { %3070 = vmatpush3.bf16.msra.mxu0 %v3179_v33  ;;  %v3220_v33 = vld [vmem:[%s4714_s3 + $0x198] ss:$12 sps:$4 sm:$0xff]  }
  0x25   :  { %3071 = vmatprep.subr.bf16.mxu0 %v3180_v38  ;;  %1530 = vmatpush1.bf16.msra.mxu1 %v3199_v43  ;;  %v3250_v43 = vld [vmem:[%s4714_s3 + $0x2a0] ss:$12 sps:$4 sm:$0xff]  }
  0x26   :  { %2659 = vmatmul.mubr.msk.bf16.gmra.mxu0 %vm238_vm0, %v3534_v41  ;;  %2667 = vmatmul.mubr.msk.bf16.gmra.mxu1 %vm238_vm0, %v3534_v41 }
  0x27   :  { %325 = vmatprep.mubr.bf16.mxu0 %v3361_v1  ;;  %438 = vmatprep.mubr.bf16.mxu1 %v3361_v1 }
  0x28   :  { %3072 = vmatpush3.bf16.msra.mxu0 %v3180_v38  ;;  %1531 = vmatprep.subr.bf16.mxu1 %v3207_v44  ;;  %v3240_v38 = vld [vmem:[%s4714_s3 + $0x2d4] ss:$12 sps:$4 sm:$0xff]   ;;  %v3258_v44 = vld [vmem:[%s4714_s3 + $0x28c] ss:$12 sps:$4 sm:$0xff]  }
  0x29   :  { %1636 = vmatprep.subr.bf16.mxu0 %v3186_v42  ;;  %1532 = vmatpush1.bf16.msra.mxu1 %v3205_v47  ;;  %v3252_v42 = vld [vmem:[%s4714_s3 + $0x2a4] ss:$12 sps:$4 sm:$0xff]  }
  0x2a   :  { %1533 = vmatprep.subr.bf16.mxu1 %v3213_v48  ;;  %v3262_v47 = vld [vmem:[%s4714_s3 + $0x270] ss:$12 sps:$4 sm:$0xff]  }
  0x2b   :  { %v3270_v48 = vld [vmem:[%s4714_s3 + $0x25c] ss:$12 sps:$4 sm:$0xff]  }
  0x2d   :  { %1534 = vmatpush1.bf16.msra.mxu1 %v3211_v50  ;;  %v3276_v50 = vld [vmem:[%s4714_s3 + $0x244] ss:$12 sps:$4 sm:$0xff]  }
  0x2e   :  { %2660 = vmatmul.mubr.msk.bf16.gmra.mxu0 %vm238_vm0, %v3563_v49  ;;  %2668 = vmatmul.mubr.msk.bf16.gmra.mxu1 %vm238_vm0, %v3563_v49 }
  0x2f   :  { %335 = vmatprep.mubr.bf16.mxu0 %v3361_v1  ;;  %448 = vmatprep.mubr.bf16.mxu1 %v3361_v1 }
  0x30   :  { %1535 = vmatprep.subr.bf16.mxu1 %v3219_v51  ;;  %v3274_v51 = vld [vmem:[%s4714_s3 + $0x240] ss:$12 sps:$4 sm:$0xff]  }
  0x31   :  { %1536 = vmatpush1.bf16.msra.mxu1 %v3217_v54  ;;  %v3793_v54 = vshrl.u32 %v83_v53, 7 }
  0x32   :  { %1537 = vmatprep.subr.bf16.mxu1 %v3225_v55 }
  0x33   :  { %4723 = vst [vmem:[#allocation2_spill] sm:$0xff] %v3793_v54  ;;  %v4720_v55 = vsub.s32 2, %v3793_v54  ;;  %v85_v59 = vsub.s32 0, %v3793_v54 }
  0x35   :  { %1538 = vmatpush1.bf16.msra.mxu1 %v3223_v57  ;;  %v3800_v57 = vld [vmem:[%s4715_s2] sm:$0x1f] }
  0x36   :  { %2661 = vmatmul.mubr.msk.bf16.gmra.mxu0 %vm238_vm0, %v3589_v56  ;;  %2669 = vmatmul.mubr.msk.bf16.gmra.mxu1 %vm238_vm0, %v3589_v56  ;;  %v3807_v60 = vrot.slane %v3800_v57, %v4720_v55 }
  0x37   :  { %345 = vmatprep.mubr.bf16.mxu0 %v3361_v1  ;;  %458 = vmatprep.mubr.bf16.mxu1 %v3361_v1 }
  0x38   :  { %1539 = vmatprep.subr.bf16.mxu1 %v3231_v58  ;;  %v89_v58 = vsub.s32 1, %v3793_v54 }
  0x39   :  { %1540 = vmatpush2.bf16.msra.mxu1 %v3229_v61 }
  0x3a   :  { %1541 = vmatprep.subr.bf16.mxu1 %v3237_v62 }
  0x3d   :  { %1542 = vmatpush2.bf16.msra.mxu1 %v3235_v0  ;;  %v3815_v0 = vrot.slane %v3800_v57, %v89_v58 }
  0x3e   :  { %2662 = vmatmul.mubr.msk.bf16.gmra.mxu0 %vm238_vm0, %v3615_v63  ;;  %2670 = vmatmul.mubr.msk.bf16.gmra.mxu1 %vm238_vm0, %v3615_v63 }
  0x3f   :  { %355 = vmatprep.mubr.bf16.mxu0 %v3361_v1  ;;  %468 = vmatprep.mubr.bf16.mxu1 %v3361_v1 }
  0x40   :  { %1543 = vmatprep.subr.bf16.mxu1 %v3243_v2  ;;  %v3820_v2 = vrot.slane %v3800_v57, %v85_v59 }
  0x41   :  { %1544 = vmatpush2.bf16.msra.mxu1 %v3241_v5 }
  0x42   :  { %1545 = vmatprep.subr.bf16.mxu1 %v3249_v6 }
  0x45   :  { %1546 = vmatpush2.bf16.msra.mxu1 %v3247_v8 }
  0x46   :  { %2663 = vmatmul.mubr.msk.bf16.gmra.mxu0 %vm238_vm0, %v49_v7  ;;  %2671 = vmatmul.mubr.msk.bf16.gmra.mxu1 %vm238_vm0, %v49_v7 }
  0x47   :  { %365 = vmatprep.mubr.bf16.mxu0 %v3361_v1  ;;  %478 = vmatprep.mubr.bf16.mxu1 %v3361_v1 }
  0x48   :  { %1547 = vmatprep.subr.bf16.mxu1 %v3255_v9 }
  0x49   :  { %1548 = vmatpush2.bf16.msra.mxu1 %v3253_v12 }
  0x4a   :  { %1549 = vmatprep.subr.bf16.mxu1 %v3261_v17 }
  0x4d   :  { %1550 = vmatpush2.bf16.msra.mxu1 %v3259_v19 }
  0x4e   :  { %2664 = vmatmul.mubr.msk.bf16.gmra.mxu0 %vm238_vm0, %v50_v13  ;;  %2672 = vmatmul.mubr.msk.bf16.gmra.mxu1 %vm238_vm0, %v50_v13 }
  0x4f   :  { %3073 = vmatprep.mubr.msk.bf16.mxu0 %vm238_vm0, %v3473_v24  ;;  %1551 = vmatprep.subr.bf16.mxu1 %v3267_v21  ;;  %v3202_v24 = vld [vmem:[%s4714_s3 + $0x1e0] ss:$12 sps:$4 sm:$0xff]  }
  0x51   :  { %1552 = vmatpush2.bf16.msra.mxu1 %v3265_v23 }
  0x52   :  { %1553 = vmatprep.subr.bf16.mxu1 %v3273_v25 }
  0x55   :  { %1554 = vmatpush2.bf16.msra.mxu1 %v3271_v27 }
  0x56   :  { %3074 = vmatmul.mubr.msk.bf16.vlgmr.msra.gmra.mxu0 %vm238_vm0, %v3499_v31  ;;  %v3279_v31 = vld [vmem:[%s4714_s3 + $0x3ac] ss:$12 sps:$4 sm:$0xff]  }
  0x57   :  { %3077 = vmatprep.mubr.msk.bf16.mxu0 %vm238_vm0, %v3534_v41  ;;  %1637 = vmatpush1.bf16.msra.mxu0 %v3184_v14  ;;  %v3244_v41 = vld [vmem:[%s4714_s3 + $0x2b8] ss:$12 sps:$4 sm:$0xff]  }
  0x58   :  { %1638 = vmatprep.subr.bf16.mxu0 %v3192_v15  ;;  %1749 = vmatprep.subr.bf16.mxu1 %v3279_v31 }
  0x5b   :  { %1639 = vmatpush1.bf16.msra.mxu0 %v3190_v16 }
  0x5c   :  { %1640 = vmatprep.subr.bf16.mxu0 %v3198_v18 }
  0x5e   :  { %3078 = vmatmul.mubr.msk.bf16.gmra.mxu0 %vm238_vm0, %v3563_v49  ;;  %v3268_v49 = vld [vmem:[%s4714_s3 + $0x258] ss:$12 sps:$4 sm:$0xff]  }
  0x5f   :  { %3081 = vmatprep.mubr.msk.bf16.mxu0 %vm238_vm0, %v3589_v56  ;;  %1641 = vmatpush1.bf16.msra.mxu0 %v3196_v20  ;;  %v97_v56 = vsub.s32 3, %v3793_v54 }
  0x60   :  { %1642 = vmatprep.subr.bf16.mxu0 %v3204_v22 }
  0x61   :  { %v3810_v61 = vrot.slane %v3800_v57, %v97_v56 }
  0x63   :  { %1643 = vmatpush1.bf16.msra.mxu0 %v3202_v24 }
  0x64   :  { %1644 = vmatprep.subr.bf16.mxu0 %v3210_v26 }
  0x66   :  { %3082 = vmatmul.mubr.msk.bf16.gmra.mxu0 %vm238_vm0, %v3615_v63 }
  0x67   :  { %3085 = vmatprep.mubr.msk.bf16.mxu0 %vm238_vm0, %v49_v7  ;;  %1645 = vmatpush1.bf16.msra.mxu0 %v3208_v28 }
  0x68   :  { %1646 = vmatprep.subr.bf16.mxu0 %v3216_v29 }
  0x6b   :  { %1647 = vmatpush1.bf16.msra.mxu0 %v3214_v30 }
  0x6c   :  { %1648 = vmatprep.subr.bf16.mxu0 %v3222_v32 }
  0x6e   :  { %3086 = vmatmul.mubr.msk.bf16.gmra.mxu0 %vm238_vm0, %v50_v13 }
  0x6f   :  { %1649 = vmatpush1.bf16.msra.mxu0 %v3220_v33 }
  0x70   :  { %1650 = vmatprep.subr.bf16.mxu0 %v3228_v34  ;;  %v3277_v34 = vld [vmem:[%s4714_s3 + $0x3a8] ss:$12 sps:$4 sm:$0xff]  }
  0x73   :  { %1651 = vmatpush1.bf16.msra.mxu0 %v3226_v35  ;;  %v3293_v35 = vld [vmem:[%s4714_s3 + $0xb0] ss:$12 sps:$4 sm:$0xff]  }
  0x74   :  { %1652 = vmatprep.subr.bf16.mxu0 %v3234_v36 }
  0x77   :  { %1653 = vmatpush2.bf16.msra.mxu0 %v3232_v37 }
  0x78   :  { %1654 = vmatprep.subr.bf16.mxu0 %v3240_v38 }
  0x7b   :  { %1655 = vmatpush2.bf16.msra.mxu0 %v3238_v39  ;;  %v3282_v39 = vld [vmem:[%s4714_s3 + $0x394] ss:$12 sps:$4 sm:$0xff]  }
  0x7c   :  { %1656 = vmatprep.subr.bf16.mxu0 %v3246_v40  ;;  %v3294_v40 = vld [vmem:[%s4714_s3 + $0x158] ss:$12 sps:$4 sm:$0xff]  }
  0x7f   :  { %1657 = vmatpush2.bf16.msra.mxu0 %v3244_v41 }
  0x80   :  { %1658 = vmatprep.subr.bf16.mxu0 %v3252_v42 }
  0x83   :  { %1659 = vmatpush2.bf16.msra.mxu0 %v3250_v43 }
  0x84   :  { %1660 = vmatprep.subr.bf16.mxu0 %v3258_v44 }
  0x87   :  { %1661 = vmatpush2.bf16.msra.mxu0 %v3256_v45 }
  0x88   :  { %1662 = vmatprep.subr.bf16.mxu0 %v3264_v46 }
  0x8b   :  { %1663 = vmatpush2.bf16.msra.mxu0 %v3262_v47 }
  0x8c   :  { %1664 = vmatprep.subr.bf16.mxu0 %v3270_v48 }
  0x8f   :  { %1665 = vmatpush2.bf16.msra.mxu0 %v3268_v49 }
  0x90   :  { %1666 = vmatprep.subr.bf16.mxu0 %v3276_v50 }
  0x93   :  { %1667 = vmatpush2.bf16.msra.mxu0 %v3274_v51 }
  0x94   :  { %2843 = vmatprep.subr.bf16.mxu0 %v3292_v52  ;;  %v3280_v52 = vld [vmem:[%s4714_s3 + $0x390] ss:$12 sps:$4 sm:$0xff]  }
  0xd6   :  { %v297_v62 = vpop.f32.mrf.mxu0  ;;  %v410_v63 = vpop.f32.mrf.mxu1 }
  0xd7   :  { %v411_v3 = vadd.f32 %v410_v63, %v3807_v60  ;;  %v298_v12 = vadd.f32 %v297_v62, %v3820_v2  ;;  %v3285_v63 = vld [vmem:[%s4714_s3 + $0x37c] ss:$12 sps:$4 sm:$0xff]  }
  0xd8   :  { %v299_v4 = vpop.f32.mrf.mxu0  ;;  %v412_v5 = vpop.f32.mrf.mxu1 }
  0xd9   :  { %v413_v6 = vadd.f32 %v412_v5, %v3810_v61  ;;  %v300_v9 = vadd.f32 %v299_v4, %v3815_v0  ;;  %v588_v13 = vmax.f32 %v411_v3, 0.0  ;;  %v586_v26 = vmax.f32 %v298_v12, 0.0  ;;  %v3295_v3 = vld [vmem:[%s4714_s3 + $0x98] ss:$12 sps:$4 sm:$0xff]  }
  0xda   :  { %v301_v7 = vpop.f32.mrf.mxu0  ;;  %v414_v8 = vpop.f32.mrf.mxu1 }
  0xdb   :  { %v302_v10 = vadd.f32 %v301_v7, %v3820_v2  ;;  %v415_v11 = vadd.f32 %v414_v8, %v3807_v60  ;;  %v589_v16 = vmax.f32 %v413_v6, 0.0  ;;  %v587_v23 = vmax.f32 %v300_v9, 0.0 }
  0xdc   :  { %v303_v14 = vpop.f32.mrf.mxu0  ;;  %v416_v15 = vpop.f32.mrf.mxu1 }
  0xdd   :  { %v593_v17 = vmax.f32 %v415_v11, 0.0  ;;  %v304_v18 = vadd.f32 %v303_v14, %v3815_v0  ;;  %v417_v19 = vadd.f32 %v416_v15, %v3810_v61  ;;  %v591_v20 = vmax.f32 %v302_v10, 0.0  ;;  %v3283_v15 = vld [vmem:[%s4714_s3 + $0x378] ss:$12 sps:$4 sm:$0xff]  }
  0xde   :  { %v307_v21 = vpop.f32.mrf.mxu0  ;;  %v420_v22 = vpop.f32.mrf.mxu1 }
  0xdf   :  { %v592_v24 = vmax.f32 %v304_v18, 0.0  ;;  %v594_v25 = vmax.f32 %v417_v19, 0.0  ;;  %v3830_v27 = vpack.c.bf16 %v593_v17, %v588_v13  ;;  %v421_v28 = vadd.f32 %v420_v22, %v3807_v60 }
  0xe0   :  { %v309_v29 = vpop.f32.mrf.mxu0  ;;  %v422_v30 = vpop.f32.mrf.mxu1  ;;  %v3844_v36 = vpack.c.bf16 %v591_v20, %v586_v26  ;;  %v308_v44 = vadd.f32 %v307_v21, %v3820_v2  ;;  %v3288_v20 = vld [vmem:[%s4714_s3 + $0x364] ss:$12 sps:$4 sm:$0xff]   ;;  %v3300_v21 = vld [vmem:[%s4714_s3 + $0x80] ss:$12 sps:$4 sm:$0xff]  }
  0xe1   :  { %v423_v31 = vadd.f32 %v422_v30, %v3810_v61  ;;  %v3834_v32 = vpack.c.bf16 %v592_v24, %v587_v23  ;;  %v3836_v33 = vpack.c.bf16 %v594_v25, %v589_v16  ;;  %v310_v41 = vadd.f32 %v309_v29, %v3815_v0  ;;  %v3299_v16 = vld [vmem:[%s4714_s3 + $0x140] ss:$12 sps:$4 sm:$0xff]   ;;  %v3301_v25 = vld [vmem:[%s4714_s3 + $0x128] ss:$12 sps:$4 sm:$0xff]  }
  0xe2   :  { %v311_v37 = vpop.f32.mrf.mxu0  ;;  %v424_v38 = vpop.f32.mrf.mxu1  ;;  %v598_v45 = vmax.f32 %v421_v28, 0.0  ;;  %v596_v7 = vmax.f32 %v308_v44, 0.0 }
  0xe3   :  { %v312_v42 = vadd.f32 %v311_v37, %v3820_v2  ;;  %v425_v43 = vadd.f32 %v424_v38, %v3807_v60  ;;  %1555 = vmatprep.mubr.bf16.mxu1 %v3834_v32  ;;  %1668 = vmatprep.mubr.bf16.mxu0 %v3836_v33  ;;  %v599_v48 = vmax.f32 %v423_v31, 0.0  ;;  %v597_v4 = vmax.f32 %v310_v41, 0.0  ;;  %v3286_v38 = vld [vmem:[%s4714_s3 + $0x360] ss:$12 sps:$4 sm:$0xff]  }
  0xe4   :  { %v313_v46 = vpop.f32.mrf.mxu0  ;;  %v426_v47 = vpop.f32.mrf.mxu1  ;;  %1556 = vmatmul.mubr.bf16.vlgmr.msra.gmra.mxu1 %v3844_v36  ;;  %1669 = vmatmul.mubr.bf16.vlgmr.msra.gmra.mxu0 %v3830_v27 }
  0xe5   :  { %v603_v49 = vmax.f32 %v425_v43, 0.0  ;;  %v314_v50 = vadd.f32 %v313_v46, %v3815_v0  ;;  %v427_v51 = vadd.f32 %v426_v47, %v3810_v61  ;;  %1750 = vmatpush1.bf16.msra.mxu1 %v3277_v34  ;;  %2844 = vmatpush3.bf16.msra.mxu0 %v3293_v35  ;;  %v601_v53 = vmax.f32 %v312_v42, 0.0  ;;  %v3291_v42 = vld [vmem:[%s4714_s3 + $0x34c] ss:$12 sps:$4 sm:$0xff]   ;;  %v3302_v43 = vld [vmem:[%s4714_s3 + $0x68] ss:$12 sps:$4 sm:$0xff]  }
  0xe6   :  { %v317_v56 = vpop.f32.mrf.mxu0  ;;  %v430_v62 = vpop.f32.mrf.mxu1  ;;  %1751 = vmatprep.subr.bf16.mxu1 %v3282_v39  ;;  %2845 = vmatprep.subr.bf16.mxu0 %v3294_v40 }
  0xe7   :  { %v602_v5 = vmax.f32 %v314_v50, 0.0  ;;  %v604_v6 = vmax.f32 %v427_v51, 0.0  ;;  %v3871_v8 = vpack.c.bf16 %v603_v49, %v598_v45  ;;  %v431_v9 = vadd.f32 %v430_v62, %v3807_v60  ;;  %v3289_v62 = vld [vmem:[%s4714_s3 + $0x348] ss:$12 sps:$4 sm:$0xff]  }
  0xe8   :  { %v319_v10 = vpop.f32.mrf.mxu0  ;;  %v432_v11 = vpop.f32.mrf.mxu1  ;;  %v3885_v17 = vpack.c.bf16 %v601_v53, %v596_v7  ;;  %v318_v26 = vadd.f32 %v317_v56, %v3820_v2  ;;  %v3307_v7 = vld [vmem:[%s4714_s3 + $0x50] ss:$12 sps:$4 sm:$0xff]  }
  0xe9   :  { %v433_v12 = vadd.f32 %v432_v11, %v3810_v61  ;;  %v3875_v13 = vpack.c.bf16 %v602_v5, %v597_v4  ;;  %v3877_v14 = vpack.c.bf16 %v604_v6, %v599_v48  ;;  %1752 = vmatpush1.bf16.msra.mxu1 %v3280_v52  ;;  %2846 = vmatpush3.bf16.msra.mxu0 %v3295_v3  ;;  %v608_v28 = vmax.f32 %v431_v9, 0.0  ;;  %v3298_v6 = vld [vmem:[%s4714_s3 + $0x334] ss:$12 sps:$4 sm:$0xff]  }
  0xea   :  { %v321_v18 = vpop.f32.mrf.mxu0  ;;  %v434_v19 = vpop.f32.mrf.mxu1  ;;  %1753 = vmatprep.subr.bf16.mxu1 %v3285_v63  ;;  %v320_v22 = vadd.f32 %v319_v10, %v3815_v0  ;;  %2847 = vmatprep.subr.bf16.mxu0 %v3299_v16  ;;  %v606_v47 = vmax.f32 %v318_v26, 0.0  ;;  %v3306_v63 = vld [vmem:[%s4714_s3 + $0x110] ss:$12 sps:$4 sm:$0xff]  }
  0xeb   :  { %v322_v23 = vadd.f32 %v321_v18, %v3820_v2  ;;  %v435_v24 = vadd.f32 %v434_v19, %v3807_v60  ;;  %1565 = vmatprep.mubr.bf16.mxu1 %v3875_v13  ;;  %1678 = vmatprep.mubr.bf16.mxu0 %v3877_v14  ;;  %v609_v31 = vmax.f32 %v433_v12, 0.0  ;;  %v3308_v12 = vld [vmem:[%s4714_s3 + $0xf8] ss:$12 sps:$4 sm:$0xff]  }
  0xec   :  { %v323_v29 = vpop.f32.mrf.mxu0  ;;  %v436_v30 = vpop.f32.mrf.mxu1  ;;  %1566 = vmatmul.mubr.bf16.gmra.mxu1 %v3885_v17  ;;  %1679 = vmatmul.mubr.bf16.gmra.mxu0 %v3871_v8  ;;  %v607_v44 = vmax.f32 %v320_v22, 0.0 }
  0xed   :  { %v613_v34 = vmax.f32 %v435_v24, 0.0  ;;  %v324_v35 = vadd.f32 %v323_v29, %v3815_v0  ;;  %v437_v37 = vadd.f32 %v436_v30, %v3810_v61  ;;  %1754 = vmatpush1.bf16.msra.mxu1 %v3283_v15  ;;  %v611_v39 = vmax.f32 %v322_v23, 0.0  ;;  %2848 = vmatpush3.bf16.msra.mxu0 %v3300_v21  ;;  %v3296_v24 = vld [vmem:[%s4714_s3 + $0x330] ss:$12 sps:$4 sm:$0xff]   ;;  %v3309_v30 = vld [vmem:[%s4714_s3 + $0x38] ss:$12 sps:$4 sm:$0xff]  }
  0xee   :  { %v327_v40 = vpop.f32.mrf.mxu0  ;;  %v440_v41 = vpop.f32.mrf.mxu1  ;;  %1755 = vmatprep.subr.bf16.mxu1 %v3288_v20  ;;  %2849 = vmatprep.subr.bf16.mxu0 %v3301_v25  ;;  %v3305_v29 = vld [vmem:[%s4714_s3 + $0x31c] ss:$12 sps:$4 sm:$0xff]  }
  0xef   :  { %v612_v45 = vmax.f32 %v324_v35, 0.0  ;;  %v614_v46 = vmax.f32 %v437_v37, 0.0  ;;  %v3915_v48 = vpack.c.bf16 %v613_v34, %v608_v28  ;;  %v441_v49 = vadd.f32 %v440_v41, %v3807_v60 }
  0xf0   :  { %v329_v50 = vpop.f32.mrf.mxu0  ;;  %v442_v51 = vpop.f32.mrf.mxu1  ;;  %v3929_v3 = vpack.c.bf16 %v611_v39, %v606_v47  ;;  %v328_v15 = vadd.f32 %v327_v40, %v3820_v2 }
  0xf1   :  { %v443_v52 = vadd.f32 %v442_v51, %v3810_v61  ;;  %v3919_v53 = vpack.c.bf16 %v612_v45, %v607_v44  ;;  %v3921_v56 = vpack.c.bf16 %v614_v46, %v609_v31  ;;  %1756 = vmatpush1.bf16.msra.mxu1 %v3286_v38  ;;  %2850 = vmatpush3.bf16.msra.mxu0 %v3302_v43  ;;  %v618_v16 = vmax.f32 %v441_v49, 0.0  ;;  %v3303_v45 = vld [vmem:[%s4714_s3 + $0x318] ss:$12 sps:$4 sm:$0xff]   ;;  %v3313_v46 = vld [vmem:[%s4714_s3 + $0xe0] ss:$12 sps:$4 sm:$0xff]  }
  0xf2   :  { %v331_v4 = vpop.f32.mrf.mxu0  ;;  %v444_v5 = vpop.f32.mrf.mxu1  ;;  %1757 = vmatprep.subr.bf16.mxu1 %v3291_v42  ;;  %v330_v9 = vadd.f32 %v329_v50, %v3815_v0  ;;  %2851 = vmatprep.subr.bf16.mxu0 %v3306_v63  ;;  %v616_v37 = vmax.f32 %v328_v15, 0.0  ;;  %v3312_v51 = vld [vmem:[%s4714_s3 + $0x304] ss:$12 sps:$4 sm:$0xff]  }
  0xf3   :  { %v332_v10 = vadd.f32 %v331_v4, %v3820_v2  ;;  %v445_v11 = vadd.f32 %v444_v5, %v3807_v60  ;;  %1575 = vmatprep.mubr.bf16.mxu1 %v3919_v53  ;;  %1688 = vmatprep.mubr.bf16.mxu0 %v3921_v56  ;;  %v619_v20 = vmax.f32 %v443_v52, 0.0  ;;  %v3314_v52 = vld [vmem:[%s4714_s3 + $0x20] ss:$12 sps:$4 sm:$0xff]   ;;  %v3315_v5 = vld [vmem:[%s4714_s3 + $0xc8] ss:$12 sps:$4 sm:$0xff]  }
  0xf4   :  { %v333_v18 = vpop.f32.mrf.mxu0  ;;  %v446_v19 = vpop.f32.mrf.mxu1  ;;  %1576 = vmatmul.mubr.bf16.gmra.mxu1 %v3929_v3  ;;  %1689 = vmatmul.mubr.bf16.gmra.mxu0 %v3915_v48  ;;  %v617_v31 = vmax.f32 %v330_v9, 0.0 }
  0xf5   :  { %v623_v21 = vmax.f32 %v445_v11, 0.0  ;;  %v334_v22 = vadd.f32 %v333_v18, %v3815_v0  ;;  %v447_v23 = vadd.f32 %v446_v19, %v3810_v61  ;;  %1758 = vmatpush1.bf16.msra.mxu1 %v3289_v62  ;;  %v621_v25 = vmax.f32 %v332_v10, 0.0  ;;  %2852 = vmatpush3.bf16.msra.mxu0 %v3307_v7  ;;  %v3310_v18 = vld [vmem:[%s4714_s3 + $0x300] ss:$12 sps:$4 sm:$0xff]  }
  0xf6   :  { %v337_v26 = vpop.f32.mrf.mxu0  ;;  %v450_v28 = vpop.f32.mrf.mxu1  ;;  %1759 = vmatprep.subr.bf16.mxu1 %v3298_v6  ;;  %2853 = vmatprep.subr.bf16.mxu0 %v3308_v12 }
  0xf7   :  { %v622_v34 = vmax.f32 %v334_v22, 0.0  ;;  %v624_v35 = vmax.f32 %v447_v23, 0.0  ;;  %v3959_v38 = vpack.c.bf16 %v623_v21, %v618_v16  ;;  %v451_v39 = vadd.f32 %v450_v28, %v3807_v60  ;;  %v3316_v22 = vld [vmem:[%s4714_s3 + $0x8] ss:$12 sps:$4 sm:$0xff]   ;;  %v3317_v23 = vld [vmem:[%s4714_s3 + $0x2f0] ss:$12 sps:$4 sm:$0xff]  }
  0xf8   :  { %v339_v40 = vpop.f32.mrf.mxu0  ;;  %v452_v41 = vpop.f32.mrf.mxu1  ;;  %v3973_v47 = vpack.c.bf16 %v621_v25, %v616_v37  ;;  %v338_v6 = vadd.f32 %v337_v26, %v3820_v2 }
  0xf9   :  { %v453_v42 = vadd.f32 %v452_v41, %v3810_v61  ;;  %v3963_v43 = vpack.c.bf16 %v622_v34, %v617_v31  ;;  %v3965_v44 = vpack.c.bf16 %v624_v35, %v619_v20  ;;  %1760 = vmatpush1.bf16.msra.mxu1 %v3296_v24  ;;  %2854 = vmatpush3.bf16.msra.mxu0 %v3309_v30  ;;  %v628_v7 = vmax.f32 %v451_v39, 0.0 }
  0xfa   :  { %v341_v49 = vpop.f32.mrf.mxu0  ;;  %v454_v50 = vpop.f32.mrf.mxu1  ;;  %1761 = vmatprep.subr.bf16.mxu1 %v3305_v29  ;;  %v340_v62 = vadd.f32 %v339_v40, %v3815_v0  ;;  %2855 = vmatprep.subr.bf16.mxu0 %v3313_v46  ;;  %v626_v28 = vmax.f32 %v338_v6, 0.0  ;;  %v4014_v40 = vld [vmem:[%s4714_s3 + $0x3b0] ss:$12 sps:$4 sm:$0xff]  }
  0xfb   :  { %v342_v63 = vadd.f32 %v341_v49, %v3820_v2  ;;  %v455_v4 = vadd.f32 %v454_v50, %v3807_v60  ;;  %1585 = vmatprep.mubr.bf16.mxu1 %v3963_v43  ;;  %1698 = vmatprep.mubr.bf16.mxu0 %v3965_v44  ;;  %v629_v11 = vmax.f32 %v453_v42, 0.0 }
  0xfc   :  { %v343_v9 = vpop.f32.mrf.mxu0  ;;  %v456_v10 = vpop.f32.mrf.mxu1  ;;  %1586 = vmatmul.mubr.bf16.gmra.mxu1 %v3973_v47  ;;  %1699 = vmatmul.mubr.bf16.gmra.mxu0 %v3959_v38  ;;  %v627_v24 = vmax.f32 %v340_v62, 0.0 }
  0xfd   :  { %v633_v12 = vmax.f32 %v455_v4, 0.0  ;;  %v344_v15 = vadd.f32 %v343_v9, %v3815_v0  ;;  %v457_v16 = vadd.f32 %v456_v10, %v3810_v61  ;;  %1762 = vmatpush1.bf16.msra.mxu1 %v3303_v45  ;;  %v631_v19 = vmax.f32 %v342_v63, 0.0  ;;  %2856 = vmatpush3.bf16.msra.mxu0 %v3314_v52 }
  0xfe   :  { %v347_v20 = vpop.f32.mrf.mxu0  ;;  %v460_v21 = vpop.f32.mrf.mxu1  ;;  %1763 = vmatprep.subr.bf16.mxu1 %v3312_v51  ;;  %2857 = vmatprep.subr.bf16.mxu0 %v3315_v5 }
  0xff   :  { %v632_v25 = vmax.f32 %v344_v15, 0.0  ;;  %v634_v26 = vmax.f32 %v457_v16, 0.0  ;;  %v4003_v29 = vpack.c.bf16 %v633_v12, %v628_v7  ;;  %v461_v30 = vadd.f32 %v460_v21, %v3807_v60 }
 0x100   :  { %v349_v31 = vpop.f32.mrf.mxu0  ;;  %v462_v34 = vpop.f32.mrf.mxu1  ;;  %v4016_v41 = vpack.c.bf16 %v631_v19, %v626_v28  ;;  %v348_v51 = vadd.f32 %v347_v20, %v3820_v2 }
 0x101   :  { %v463_v35 = vadd.f32 %v462_v34, %v3810_v61  ;;  %v4007_v37 = vpack.c.bf16 %v632_v25, %v627_v24  ;;  %v4009_v39 = vpack.c.bf16 %v634_v26, %v629_v11  ;;  %1764 = vmatpush1.bf16.msra.mxu1 %v3310_v18  ;;  %2858 = vmatpush3.bf16.msra.mxu0 %v3316_v22  ;;  %v638_v52 = vmax.f32 %v461_v30, 0.0 }
 0x102   :  { %v351_v42 = vpop.f32.mrf.mxu0  ;;  %v464_v45 = vpop.f32.mrf.mxu1  ;;  %2907 = vmatprep.subr.bf16.mxu1 %v3317_v23  ;;  %v350_v46 = vadd.f32 %v349_v31, %v3815_v0  ;;  %3089 = vmatprep.subr.bf16.mxu0 %v4014_v40  ;;  %v636_v18 = vmax.f32 %v348_v51, 0.0 }
 0x103   :  { %v352_v49 = vadd.f32 %v351_v42, %v3820_v2  ;;  %v465_v50 = vadd.f32 %v464_v45, %v3807_v60  ;;  %1595 = vmatprep.mubr.bf16.mxu1 %v4007_v37  ;;  %1708 = vmatprep.mubr.bf16.mxu0 %v4009_v39  ;;  %v639_v4 = vmax.f32 %v463_v35, 0.0 }
 0x104   :  { %v353_v62 = vpop.f32.mrf.mxu0  ;;  %v466_v63 = vpop.f32.mrf.mxu1  ;;  %1596 = vmatmul.mubr.bf16.gmra.mxu1 %v4016_v41  ;;  %1709 = vmatmul.mubr.bf16.gmra.mxu0 %v4003_v29  ;;  %v637_v12 = vmax.f32 %v350_v46, 0.0 }
 0x105   :  { %v643_v5 = vmax.f32 %v465_v50, 0.0  ;;  %v354_v6 = vadd.f32 %v353_v62, %v3815_v0  ;;  %v467_v7 = vadd.f32 %v466_v63, %v3810_v61  ;;  %v641_v9 = vmax.f32 %v352_v49, 0.0 }
 0x106   :  { %v357_v10 = vpop.f32.mrf.mxu0  ;;  %v470_v11 = vpop.f32.mrf.mxu1 }
 0x107   :  { %v642_v15 = vmax.f32 %v354_v6, 0.0  ;;  %v644_v16 = vmax.f32 %v467_v7, 0.0  ;;  %v4029_v19 = vpack.c.bf16 %v643_v5, %v638_v52  ;;  %v471_v20 = vadd.f32 %v470_v11, %v3807_v60 }
 0x108   :  { %v359_v21 = vpop.f32.mrf.mxu0  ;;  %v472_v22 = vpop.f32.mrf.mxu1  ;;  %v4037_v26 = vpack.c.bf16 %v641_v9, %v636_v18  ;;  %v358_v42 = vadd.f32 %v357_v10, %v3820_v2 }
 0x109   :  { %v473_v23 = vadd.f32 %v472_v22, %v3810_v61  ;;  %v4033_v24 = vpack.c.bf16 %v642_v15, %v637_v12  ;;  %v4035_v25 = vpack.c.bf16 %v644_v16, %v639_v4  ;;  %v360_v31 = vadd.f32 %v359_v21, %v3815_v0 }
 0x10a   :  { %v361_v28 = vpop.f32.mrf.mxu0  ;;  %v474_v30 = vpop.f32.mrf.mxu1  ;;  %v648_v45 = vmax.f32 %v471_v20, 0.0  ;;  %v646_v10 = vmax.f32 %v358_v42, 0.0 }
 0x10b   :  { %v362_v34 = vadd.f32 %v361_v28, %v3820_v2  ;;  %v475_v35 = vadd.f32 %v474_v30, %v3807_v60  ;;  %1605 = vmatprep.mubr.bf16.mxu1 %v4033_v24  ;;  %1718 = vmatprep.mubr.bf16.mxu0 %v4035_v25  ;;  %v649_v50 = vmax.f32 %v473_v23, 0.0  ;;  %v647_v6 = vmax.f32 %v360_v31, 0.0 }
 0x10c   :  { %v363_v46 = vpop.f32.mrf.mxu0  ;;  %v476_v49 = vpop.f32.mrf.mxu1  ;;  %1606 = vmatmul.mubr.bf16.gmra.mxu1 %v4037_v26  ;;  %1719 = vmatmul.mubr.bf16.gmra.mxu0 %v4029_v19 }
 0x10d   :  { %v653_v51 = vmax.f32 %v475_v35, 0.0  ;;  %v364_v52 = vadd.f32 %v363_v46, %v3815_v0  ;;  %v477_v62 = vadd.f32 %v476_v49, %v3810_v61  ;;  %v651_v63 = vmax.f32 %v362_v34, 0.0 }
 0x10e   :  { %v367_v4 = vpop.f32.mrf.mxu0  ;;  %v480_v5 = vpop.f32.mrf.mxu1  ;;  %v101_v35 = vsub.s32 4, %v3793_v54 }
 0x10f   :  { %v652_v7 = vmax.f32 %v364_v52, 0.0  ;;  %v654_v9 = vmax.f32 %v477_v62, 0.0  ;;  %v4049_v11 = vpack.c.bf16 %v653_v51, %v648_v45  ;;  %v481_v12 = vadd.f32 %v480_v5, %v3807_v60 }
 0x110   :  { %v369_v15 = vpop.f32.mrf.mxu0  ;;  %v482_v16 = vpop.f32.mrf.mxu1  ;;  %v4057_v22 = vpack.c.bf16 %v651_v63, %v646_v10  ;;  %v368_v42 = vadd.f32 %v367_v4, %v3820_v2 }
 0x111   :  { %v483_v18 = vadd.f32 %v482_v16, %v3810_v61  ;;  %v4053_v20 = vpack.c.bf16 %v652_v7, %v647_v6  ;;  %v4055_v21 = vpack.c.bf16 %v654_v9, %v649_v50  ;;  %v370_v30 = vadd.f32 %v369_v15, %v3815_v0 }
 0x112   :  { %v371_v23 = vpop.f32.mrf.mxu0  ;;  %v484_v28 = vpop.f32.mrf.mxu1  ;;  %v658_v45 = vmax.f32 %v481_v12, 0.0  ;;  %v656_v4 = vmax.f32 %v368_v42, 0.0 }
 0x113   :  { %v372_v31 = vadd.f32 %v371_v23, %v3820_v2  ;;  %v485_v34 = vadd.f32 %v484_v28, %v3807_v60  ;;  %1615 = vmatprep.mubr.bf16.mxu1 %v4053_v20  ;;  %1728 = vmatprep.mubr.bf16.mxu0 %v4055_v21  ;;  %v659_v50 = vmax.f32 %v483_v18, 0.0  ;;  %v657_v5 = vmax.f32 %v370_v30, 0.0 }
 0x114   :  { %v373_v46 = vpop.f32.mrf.mxu0  ;;  %v486_v49 = vpop.f32.mrf.mxu1  ;;  %1616 = vmatmul.mubr.bf16.gmra.mxu1 %v4057_v22  ;;  %1729 = vmatmul.mubr.bf16.gmra.mxu0 %v4049_v11  ;;  %v4071_v2 = vrot.slane %v3800_v57, %v101_v35  ;;  %v3318_v35 = vld [vmem:[%s4714_s3 + $0x230] ss:$12 sps:$4 sm:$0xff]  }
 0x115   :  { %v663_v51 = vmax.f32 %v485_v34, 0.0  ;;  %v374_v52 = vadd.f32 %v373_v46, %v3815_v0  ;;  %v487_v60 = vadd.f32 %v486_v49, %v3810_v61  ;;  %v661_v62 = vmax.f32 %v372_v31, 0.0  ;;  %v3328_v49 = vld [vmem:[%s4714_s3 + $0x398] ss:$12 sps:$4 sm:$0xff]  }
 0x116   :  { %v3075_v63 = vpop.f32.mrf.mxu0 }
 0x117   :  { %v662_v6 = vmax.f32 %v374_v52, 0.0  ;;  %v664_v7 = vmax.f32 %v487_v60, 0.0  ;;  %v4073_v9 = vpack.c.bf16 %v663_v51, %v658_v45  ;;  %v4079_v16 = vpack.c.bf16 %v661_v62, %v656_v4  ;;  %v3319_v45 = vld [vmem:[%s4714_s3 + $0x2d8] ss:$12 sps:$4 sm:$0xff]   ;;  %v3321_v52 = vld [vmem:[%s4714_s3 + $0x2c0] ss:$12 sps:$4 sm:$0xff]  }
 0x118   :  { %v523_v10 = vpop.f32.mrf.mxu0  ;;  %v3332_v4 = vld [vmem:[%s4714_s3 + $0x368] ss:$12 sps:$4 sm:$0xff]  }
 0x119   :  { %v4075_v12 = vpack.c.bf16 %v662_v6, %v657_v5  ;;  %v4077_v15 = vpack.c.bf16 %v664_v7, %v659_v50  ;;  %v524_v61 = vadd.f32 %v523_v10, %v4071_v2  ;;  %v3320_v50 = vld [vmem:[%s4714_s3 + $0x218] ss:$12 sps:$4 sm:$0xff]   ;;  %v3322_v5 = vld [vmem:[%s4714_s3 + $0x200] ss:$12 sps:$4 sm:$0xff]  }
 0x11a   :  { %v3076_v0 = vpop.f32.mrf.mxu0  ;;  %v3331_v6 = vld [vmem:[%s4714_s3 + $0x380] ss:$12 sps:$4 sm:$0xff]  }
 0x11b   :  { %1625 = vmatprep.mubr.bf16.mxu1 %v4075_v12  ;;  %1738 = vmatprep.mubr.bf16.mxu0 %v4077_v15  ;;  %v590_v28 = vmax.f32 %v524_v61, 0.0  ;;  %v535_v42 = vadd.f32 %v3076_v0, %v4071_v2  ;;  %v3324_v61 = vld [vmem:[%s4714_s3 + $0x1e8] ss:$12 sps:$4 sm:$0xff]  }
 0x11c   :  { %v526_v18 = vpop.f32.mrf.mxu0  ;;  %1626 = vmatmul.mubr.bf16.gmra.mxu1 %v4079_v16  ;;  %1739 = vmatmul.mubr.bf16.gmra.mxu0 %v4073_v9 }
 0x11d   :  { %v527_v57 = vadd.f32 %v526_v18, %v4071_v2  ;;  %1894 = vmatprep.mubr.bf16.mxu0 %v3834_v32  ;;  %1781 = vmatprep.mubr.bf16.mxu1 %v3361_v1  ;;  %v532_v32 = vadd.f32 %v3075_v63, %v4071_v2  ;;  %v605_v51 = vmax.f32 %v535_v42, 0.0  ;;  %v3329_v42 = vld [vmem:[%s4714_s3 + $0x278] ss:$12 sps:$4 sm:$0xff]  }
 0x11e   :  { %v3079_v23 = vpop.f32.mrf.mxu0 }
 0x11f   :  { %v595_v30 = vmax.f32 %v527_v57, 0.0  ;;  %v600_v60 = vmax.f32 %v532_v32, 0.0  ;;  %v3330_v32 = vld [vmem:[%s4714_s3 + $0x1b8] ss:$12 sps:$4 sm:$0xff]  }
 0x120   :  { %v539_v31 = vpop.f32.mrf.mxu0 }
 0x121   :  { %v4089_v34 = vpack.c.bf16 %v595_v30, %v590_v28  ;;  %v4113_v62 = vpack.c.bf16 %v605_v51, %v600_v60  ;;  %v3326_v30 = vld [vmem:[%s4714_s3 + $0x1d0] ss:$12 sps:$4 sm:$0xff]  }
 0x122   :  { %v3080_v46 = vpop.f32.mrf.mxu0 }
 0x123   :  { %v551_v57 = vadd.f32 %v3080_v46, %v4071_v2 }
 0x124   :  { %1782 = vmatmul.mubr.bf16.vlgmr.msra.gmra.mxu1 %v4089_v34  ;;  %1895 = vmatmul.mubr.bf16.vlgmr.msra.gmra.mxu0 %v3844_v36  ;;  %v542_v36 = vpop.f32.mrf.mxu0 }
 0x125   :  { %2908 = vmatpush3.bf16.msra.mxu1 %v3318_v35  ;;  %1902 = vmatprep.mubr.bf16.mxu0 %v3875_v13  ;;  %v540_v13 = vadd.f32 %v539_v31, %v4071_v2  ;;  %v543_v63 = vadd.f32 %v542_v36, %v4071_v2  ;;  %v3335_v31 = vld [vmem:[%s4714_s3 + $0x350] ss:$12 sps:$4 sm:$0xff]   ;;  %v625_v46 = vmax.f32 %v551_v57, 0.0  ;;  %v3339_v36 = vld [vmem:[%s4714_s3 + $0x320] ss:$12 sps:$4 sm:$0xff]  }
 0x126   :  { %1791 = vmatprep.mubr.bf16.mxu1 %v3361_v1  ;;  %2909 = vmatprep.subr.bf16.mxu1 %v3319_v45  ;;  %v4123_v7 = vpop.f32.mrf.mxu0 }
 0x127   :  { %3090 = vmatpush3.bf16.msra.mxu0 %v4014_v40  ;;  %v3323_v40 = vld [vmem:[%s4714_s3 + $0x2a8] ss:$12 sps:$4 sm:$0xff]   ;;  %v610_v10 = vmax.f32 %v540_v13, 0.0  ;;  %v615_v0 = vmax.f32 %v543_v63, 0.0 }
 0x128   :  { %3091 = vmatprep.subr.bf16.mxu0 %v3328_v49  ;;  %v555_v18 = vpop.f32.mrf.mxu0  ;;  %v3337_v13 = vld [vmem:[%s4714_s3 + $0x248] ss:$12 sps:$4 sm:$0xff]  }
 0x129   :  { %2910 = vmatpush3.bf16.msra.mxu1 %v3320_v50  ;;  %v4143_v28 = vpack.c.bf16 %v615_v0, %v610_v10  ;;  %v3340_v63 = vld [vmem:[%s4714_s3 + $0x308] ss:$12 sps:$4 sm:$0xff]  }
 0x12a   :  { %2911 = vmatprep.subr.bf16.mxu1 %v3321_v52  ;;  %v3084_v35 = vpop.f32.mrf.mxu0  ;;  %v3334_v52 = vld [vmem:[%s4714_s3 + $0x1a0] ss:$12 sps:$4 sm:$0xff]  }
 0x12b   :  { %3092 = vmatpush3.bf16.msra.mxu0 %v3328_v49  ;;  %v567_v10 = vadd.f32 %v3084_v35, %v4071_v2 }
 0x12c   :  { %1792 = vmatmul.mubr.bf16.gmra.mxu1 %v4113_v62  ;;  %1903 = vmatmul.mubr.bf16.gmra.mxu0 %v3885_v17  ;;  %v3325_v17 = vld [vmem:[%s4714_s3 + $0x290] ss:$12 sps:$4 sm:$0xff]   ;;  %v558_v49 = vpop.f32.mrf.mxu0 }
 0x12d   :  { %1910 = vmatprep.mubr.bf16.mxu0 %v3919_v53  ;;  %1801 = vmatprep.mubr.bf16.mxu1 %v3361_v1  ;;  %v548_v53 = vadd.f32 %v3079_v23, %v4071_v2  ;;  %v3336_v23 = vld [vmem:[%s4714_s3 + $0x338] ss:$12 sps:$4 sm:$0xff]   ;;  %v559_v51 = vadd.f32 %v558_v49, %v4071_v2 }
 0x12e   :  { %2912 = vmatpush3.bf16.msra.mxu1 %v3322_v5  ;;  %3093 = vmatprep.subr.bf16.mxu0 %v3331_v6  ;;  %v3087_v60 = vpop.f32.mrf.mxu0 }
 0x12f   :  { %2913 = vmatprep.subr.bf16.mxu1 %v3323_v40  ;;  %3094 = vmatpush3.bf16.msra.mxu0 %v3331_v6  ;;  %v620_v45 = vmax.f32 %v548_v53, 0.0  ;;  %v635_v6 = vmax.f32 %v559_v51, 0.0  ;;  %v3338_v40 = vld [vmem:[%s4714_s3 + $0x188] ss:$12 sps:$4 sm:$0xff]  }
 0x130   :  { %3095 = vmatprep.subr.bf16.mxu0 %v3332_v4 }
 0x131   :  { %v4167_v50 = vpack.c.bf16 %v625_v46, %v620_v45 }
 0x132   :  { %2914 = vmatpush3.bf16.msra.mxu1 %v3324_v61 }
 0x133   :  { %2915 = vmatprep.subr.bf16.mxu1 %v3325_v17  ;;  %3096 = vmatpush3.bf16.msra.mxu0 %v3332_v4  ;;  %v571_v4 = vpop.f32.mrf.mxu0 }
 0x134   :  { %1802 = vmatmul.mubr.bf16.gmra.mxu1 %v4143_v28  ;;  %1911 = vmatmul.mubr.bf16.gmra.mxu0 %v3929_v3  ;;  %v3333_v3 = vld [vmem:[%s4714_s3 + $0x260] ss:$12 sps:$4 sm:$0xff]   ;;  %v572_v57 = vadd.f32 %v571_v4, %v4071_v2 }
 0x135   :  { %1918 = vmatprep.mubr.bf16.mxu0 %v3963_v43  ;;  %1811 = vmatprep.mubr.bf16.mxu1 %v3361_v1  ;;  %v556_v43 = vadd.f32 %v555_v18, %v4071_v2  ;;  %v3088_v0 = vpop.f32.mrf.mxu0  ;;  %v645_v18 = vmax.f32 %v567_v10, 0.0  ;;  %v3359_v4 = vld [vmem:[%s4716_s5 + $0x88] sm:$0xff]  }
 0x136   :  { %2916 = vmatpush3.bf16.msra.mxu1 %v3326_v30  ;;  %3097 = vmatprep.subr.bf16.mxu0 %v3335_v31  ;;  %v583_v35 = vadd.f32 %v3088_v0, %v4071_v2 }
 0x137   :  { %2917 = vmatprep.subr.bf16.mxu1 %v3329_v42  ;;  %3098 = vmatpush3.bf16.msra.mxu0 %v3335_v31  ;;  %v630_v5 = vmax.f32 %v556_v43, 0.0  ;;  %v574_v17 = vpop.f32.mrf.mxu0  ;;  %v580_v31 = vadd.f32 %v3087_v60, %v4071_v2 }
 0x138   :  { %3099 = vmatprep.subr.bf16.mxu0 %v3336_v23 }
 0x13a   :  { %2918 = vmatpush3.bf16.msra.mxu1 %v3330_v32 }
 0x13b   :  { %2919 = vmatprep.subr.bf16.mxu1 %v3333_v3  ;;  %3100 = vmatpush3.bf16.msra.mxu0 %v3336_v23  ;;  %v3357_v3 = vld [vmem:[%s4716_s5 + $0x98] sm:$0xff]  }
 0x13c   :  { %1812 = vmatmul.mubr.bf16.gmra.mxu1 %v4167_v50  ;;  %1919 = vmatmul.mubr.bf16.gmra.mxu0 %v3973_v47  ;;  %v564_v47 = vadd.f32 %v4123_v7, %v4071_v2  ;;  %v575_v7 = vadd.f32 %v574_v17, %v4071_v2  ;;  %v3342_v2 = vld [vmem:[%s4716_s5 + $0x38] sm:$0xff]   ;;  %v3360_v17 = vld [vmem:[%s4716_s5 + $0x80] sm:$0xff]  }
 0x13d   :  { %1926 = vmatprep.mubr.bf16.mxu0 %v4007_v37  ;;  %1821 = vmatprep.mubr.bf16.mxu1 %v3361_v1  ;;  %v690_v37 = vpack.c.bf16 %v635_v6, %v630_v5 }
 0x13e   :  { %2920 = vmatpush3.bf16.msra.mxu1 %v3334_v52  ;;  %3101 = vmatprep.subr.bf16.mxu0 %v3339_v36  ;;  %v640_v61 = vmax.f32 %v564_v47, 0.0  ;;  %v655_v30 = vmax.f32 %v575_v7, 0.0 }
 0x13f   :  { %2921 = vmatprep.subr.bf16.mxu1 %v3337_v13  ;;  %3102 = vmatpush3.bf16.msra.mxu0 %v3339_v36  ;;  %v3358_v13 = vld [vmem:[%s4716_s5 + $0x90] sm:$0xff]  }
 0x140   :  { %3103 = vmatprep.subr.bf16.mxu0 %v3340_v63  ;;  %v695_v53 = vpack.c.bf16 %v645_v18, %v640_v61 }
 0x142   :  { %2922 = vmatpush3.bf16.msra.mxu1 %v3338_v40 }
 0x143   :  { %3104 = vmatpush3.bf16.msra.mxu0 %v3340_v63 }
 0x144   :  { %1822 = vmatmul.mubr.bf16.gmra.mxu1 %v690_v37  ;;  %1927 = vmatmul.mubr.bf16.gmra.mxu0 %v4016_v41  ;;  %v650_v41 = vmax.f32 %v572_v57, 0.0 }
 0x145   :  { %1934 = vmatprep.mubr.bf16.mxu0 %v4033_v24  ;;  %1831 = vmatprep.mubr.bf16.mxu1 %v3361_v1  ;;  %v3341_v24 = vld [vmem:[%s4716_s5 + $0x78] sm:$0xff]  }
 0x146   :  { %v700_v42 = vpack.c.bf16 %v655_v30, %v650_v41  ;;  %2987 = vmatprep.subr.bf16.mxu1 %v3341_v24  ;;  %3121 = vmatprep.subr.bf16.mxu0 %v3357_v3 }
 0x14c   :  { %1832 = vmatmul.mubr.bf16.gmra.mxu1 %v695_v53  ;;  %1935 = vmatmul.mubr.bf16.gmra.mxu0 %v4037_v26  ;;  %v660_v26 = vmax.f32 %v580_v31, 0.0 }
 0x14d   :  { %1942 = vmatprep.mubr.bf16.mxu0 %v4053_v20  ;;  %1841 = vmatprep.mubr.bf16.mxu1 %v3361_v1  ;;  %v665_v20 = vmax.f32 %v583_v35, 0.0 }
 0x14f   :  { %v705_v23 = vpack.c.bf16 %v665_v20, %v660_v26 }
 0x154   :  { %1842 = vmatmul.mubr.bf16.gmra.mxu1 %v700_v42  ;;  %1943 = vmatmul.mubr.bf16.gmra.mxu0 %v4057_v22  ;;  %v3343_v22 = vld [vmem:[%s4716_s5 + $0x70] sm:$0xff]  }
 0x155   :  { %1950 = vmatprep.mubr.bf16.mxu0 %v4075_v12  ;;  %1851 = vmatprep.mubr.bf16.mxu1 %v3361_v1  ;;  %v3344_v1 = vld [vmem:[%s4716_s5 + $0x30] sm:$0xff]   ;;  %v3348_v12 = vld [vmem:[%s4716_s5 + $0x20] sm:$0xff]  }
 0x15c   :  { %1852 = vmatmul.mubr.bf16.gmra.mxu1 %v705_v23  ;;  %1951 = vmatmul.mubr.bf16.gmra.mxu0 %v4079_v16  ;;  %v3349_v16 = vld [vmem:[%s4716_s5 + $0x58] sm:$0xff]  }
 0x15d   :  { %1991 = vmatprep.mubr.bf16.mxu1 %v3836_v33  ;;  %3105 = vmatprep.mubr.bf16.mxu0 %v4089_v34  ;;  %v3345_v33 = vld [vmem:[%s4716_s5 + $0x68] sm:$0xff]   ;;  %v3352_v34 = vld [vmem:[%s4716_s5 + $0x10] sm:$0xff]  }
 0x164   :  { %1992 = vmatmul.mubr.bf16.vlgmr.msra.gmra.mxu1 %v3830_v27  ;;  %3106 = vmatmul.mubr.bf16.vlgmr.msra.gmra.mxu0 %v4113_v62  ;;  %v3346_v27 = vld [vmem:[%s4716_s5 + $0x28] sm:$0xff]  }
 0x165   :  { %1999 = vmatprep.mubr.bf16.mxu1 %v3877_v14  ;;  %3109 = vmatprep.mubr.bf16.mxu0 %v4143_v28  ;;  %v3347_v14 = vld [vmem:[%s4716_s5 + $0x60] sm:$0xff]   ;;  %v3353_v62 = vld [vmem:[%s4716_s5 + $0x48] sm:$0xff]  }
 0x166   :  { %2988 = vmatpush3.bf16.msra.mxu1 %v3342_v2  ;;  %v3354_v28 = vld [vmem:[%s4716_s5 + $0x8] sm:$0xff]   ;;  %3122 = vmatpush3.bf16.msra.mxu0 %v3357_v3 }
 0x167   :  { %2989 = vmatprep.subr.bf16.mxu1 %v3343_v22  ;;  %3123 = vmatprep.subr.bf16.mxu0 %v3358_v13 }
 0x16a   :  { %2990 = vmatpush3.bf16.msra.mxu1 %v3344_v1  ;;  %3124 = vmatpush3.bf16.msra.mxu0 %v3358_v13 }
 0x16b   :  { %2991 = vmatprep.subr.bf16.mxu1 %v3345_v33  ;;  %3125 = vmatprep.subr.bf16.mxu0 %v3359_v4 }
 0x16c   :  { %2000 = vmatmul.mubr.bf16.gmra.mxu1 %v3871_v8  ;;  %3110 = vmatmul.mubr.bf16.gmra.mxu0 %v4167_v50  ;;  %v3350_v8 = vld [vmem:[%s4716_s5 + $0x18] sm:$0xff]  }
 0x16d   :  { %2007 = vmatprep.mubr.bf16.mxu1 %v3921_v56  ;;  %3113 = vmatprep.mubr.bf16.mxu0 %v690_v37  ;;  %v3351_v56 = vld [vmem:[%s4716_s5 + $0x50] sm:$0xff]  }
 0x16e   :  { %2992 = vmatpush3.bf16.msra.mxu1 %v3346_v27  ;;  %3126 = vmatpush3.bf16.msra.mxu0 %v3359_v4 }
 0x16f   :  { %2993 = vmatprep.subr.bf16.mxu1 %v3347_v14  ;;  %3127 = vmatprep.subr.bf16.mxu0 %v3360_v17 }
 0x172   :  { %2994 = vmatpush3.bf16.msra.mxu1 %v3348_v12  ;;  %3128 = vmatpush3.bf16.msra.mxu0 %v3360_v17 }
 0x173   :  { %2995 = vmatprep.subr.bf16.mxu1 %v3349_v16 }
 0x174   :  { %2008 = vmatmul.mubr.bf16.gmra.mxu1 %v3915_v48  ;;  %3114 = vmatmul.mubr.bf16.gmra.mxu0 %v695_v53  ;;  %v3355_v48 = vld [vmem:[%s4716_s5 + $0x40] sm:$0xff]  }
 0x175   :  { %2015 = vmatprep.mubr.bf16.mxu1 %v3965_v44  ;;  %3117 = vmatprep.mubr.bf16.mxu0 %v700_v42  ;;  %v3356_v44 = vld [vmem:[%s4716_s5] sm:$0xff]  }
 0x176   :  { %2996 = vmatpush3.bf16.msra.mxu1 %v3350_v8 }
 0x177   :  { %2997 = vmatprep.subr.bf16.mxu1 %v3351_v56 }
 0x17a   :  { %2998 = vmatpush3.bf16.msra.mxu1 %v3352_v34 }
 0x17b   :  { %2999 = vmatprep.subr.bf16.mxu1 %v3353_v62 }
 0x17c   :  { %2016 = vmatmul.mubr.bf16.gmra.mxu1 %v3959_v38  ;;  %3118 = vmatmul.mubr.bf16.gmra.mxu0 %v705_v23  ;;  %v4278_v38 = vld [vmem:[%s4717_s4] sm:$0x7] }
 0x17d   :  { %2023 = vmatprep.mubr.bf16.mxu1 %v4009_v39  ;;  %4724 = vst [vmem:[#allocation3_spill] sm:$0xff] %v4278_v38 }
 0x17e   :  { %3000 = vmatpush3.bf16.msra.mxu1 %v3354_v28 }
 0x17f   :  { %3001 = vmatprep.subr.bf16.mxu1 %v3355_v48 }
 0x182   :  { %3002 = vmatpush3.bf16.msra.mxu1 %v3356_v44 }
 0x184   :  { %2024 = vmatmul.mubr.bf16.gmra.mxu1 %v4003_v29  ;;  %v4283_v29 = vrot.slane %v4278_v38, %v85_v59 }
 0x185   :  { %2031 = vmatprep.mubr.bf16.mxu1 %v4035_v25 }
 0x18c   :  { %2032 = vmatmul.mubr.bf16.gmra.mxu1 %v4029_v19 }
 0x18d   :  { %2039 = vmatprep.mubr.bf16.mxu1 %v4055_v21 }
 0x194   :  { %2040 = vmatmul.mubr.bf16.gmra.mxu1 %v4049_v11 }
 0x195   :  { %2047 = vmatprep.mubr.bf16.mxu1 %v4077_v15 }
 0x19c   :  { %2048 = vmatmul.mubr.bf16.gmra.mxu1 %v4073_v9 }
 0x1a4   :  { %v1557_v39 = vpop.f32.mrf.mxu1  ;;  %v1670_v19 = vpop.f32.mrf.mxu0 }
 0x1a5   :  { %v1558_v25 = vadd.f32 %v1557_v39, %v4283_v29 }
 0x1a6   :  { %v4286_v21 = vpop.f32.mrf.mxu1  ;;  %v4288_v11 = vpop.f32.mrf.mxu0 }
 0x1a7   :  { %v4290_v15 = vadd.f32 %v1670_v19, %v1558_v25 }
 0x1a8   :  { %v4292_v9 = vpop.f32.mrf.mxu1  ;;  %v4294_v45 = vpop.f32.mrf.mxu0 }
 0x1aa   :  { %v4296_v46 = vpop.f32.mrf.mxu1  ;;  %v4298_v32 = vpop.f32.mrf.mxu0 }
 0x1ac   :  { %v1567_v59 = vpop.f32.mrf.mxu1  ;;  %v1680_v49 = vpop.f32.mrf.mxu0 }
 0x1ad   :  { %v1568_v50 = vadd.f32 %v1567_v59, %v4283_v29 }
 0x1ae   :  { %v4304_v43 = vpop.f32.mrf.mxu1  ;;  %v4306_v51 = vpop.f32.mrf.mxu0 }
 0x1af   :  { %v4308_v52 = vadd.f32 %v1680_v49, %v1568_v50 }
 0x1b0   :  { %v4310_v36 = vpop.f32.mrf.mxu1  ;;  %v4312_v60 = vpop.f32.mrf.mxu0 }
 0x1b2   :  { %v4317_v63 = vpop.f32.mrf.mxu1  ;;  %v4319_v5 = vpop.f32.mrf.mxu0 }
 0x1b4   :  { %v1577_v6 = vpop.f32.mrf.mxu1  ;;  %v1690_v40 = vpop.f32.mrf.mxu0 }
 0x1b5   :  { %v1578_v47 = vadd.f32 %v1577_v6, %v4283_v29 }
 0x1b6   :  { %v4325_v10 = vpop.f32.mrf.mxu1  ;;  %v4327_v37 = vpop.f32.mrf.mxu0 }
 0x1b7   :  { %v4329_v0 = vadd.f32 %v1690_v40, %v1578_v47 }
 0x1b8   :  { %v4331_v61 = vpop.f32.mrf.mxu1  ;;  %v4333_v18 = vpop.f32.mrf.mxu0 }
 0x1ba   :  { %v4338_v53 = vpop.f32.mrf.mxu1  ;;  %v4340_v57 = vpop.f32.mrf.mxu0 }
 0x1bc   :  { %v1587_v7 = vpop.f32.mrf.mxu1  ;;  %v1700_v41 = vpop.f32.mrf.mxu0 }
 0x1bd   :  { %v1588_v30 = vadd.f32 %v1587_v7, %v4283_v29 }
 0x1be   :  { %v4343_v24 = vpop.f32.mrf.mxu1  ;;  %v4345_v31 = vpop.f32.mrf.mxu0 }
 0x1bf   :  { %v4347_v35 = vadd.f32 %v1700_v41, %v1588_v30 }
 0x1c0   :  { %v4349_v42 = vpop.f32.mrf.mxu1  ;;  %v4351_v26 = vpop.f32.mrf.mxu0 }
 0x1c2   :  { %v4353_v20 = vpop.f32.mrf.mxu1  ;;  %v4355_v23 = vpop.f32.mrf.mxu0 }
 0x1c4   :  { %v1597_v2 = vpop.f32.mrf.mxu1  ;;  %v1710_v22 = vpop.f32.mrf.mxu0 }
 0x1c5   :  { %v1598_v1 = vadd.f32 %v1597_v2, %v4283_v29 }
 0x1c6   :  { %v4358_v33 = vpop.f32.mrf.mxu1  ;;  %v4360_v27 = vpop.f32.mrf.mxu0 }
 0x1c7   :  { %v4362_v14 = vadd.f32 %v1710_v22, %v1598_v1 }
 0x1c8   :  { %v4364_v12 = vpop.f32.mrf.mxu1  ;;  %v4366_v16 = vpop.f32.mrf.mxu0 }
 0x1ca   :  { %v4368_v8 = vpop.f32.mrf.mxu1  ;;  %v4370_v56 = vpop.f32.mrf.mxu0 }
 0x1cc   :  { %v1607_v34 = vpop.f32.mrf.mxu1  ;;  %v1720_v62 = vpop.f32.mrf.mxu0 }
 0x1cd   :  { %v1608_v28 = vadd.f32 %v1607_v34, %v4283_v29 }
 0x1ce   :  { %v4373_v48 = vpop.f32.mrf.mxu1  ;;  %v4375_v44 = vpop.f32.mrf.mxu0 }
 0x1cf   :  { %v4377_v39 = vadd.f32 %v1720_v62, %v1608_v28  ;;  %v4410_v62 = vrot.slane %v4278_v38, %v89_v58 }
 0x1d0   :  { %v4379_v19 = vpop.f32.mrf.mxu1  ;;  %v4381_v25 = vpop.f32.mrf.mxu0 }
 0x1d1   :  { %v1564_v58 = vadd.f32 %v4296_v46, %v4410_v62  ;;  %v1570_v46 = vadd.f32 %v4304_v43, %v4410_v62 }
 0x1d2   :  { %v4383_v59 = vpop.f32.mrf.mxu1  ;;  %v4385_v49 = vpop.f32.mrf.mxu0 }
 0x1d4   :  { %v1617_v3 = vpop.f32.mrf.mxu1  ;;  %v1730_v50 = vpop.f32.mrf.mxu0 }
 0x1d5   :  { %v1618_v13 = vadd.f32 %v1617_v3, %v4283_v29 }
 0x1d6   :  { %v4388_v6 = vpop.f32.mrf.mxu1  ;;  %v4390_v40 = vpop.f32.mrf.mxu0 }
 0x1d7   :  { %v4392_v4 = vadd.f32 %v1730_v50, %v1618_v13 }
 0x1d8   :  { %v4394_v47 = vpop.f32.mrf.mxu1  ;;  %v4396_v17 = vpop.f32.mrf.mxu0 }
 0x1d9   :  { %4725 = vst [vmem:[#allocation4_spill] sm:$0xff] %v4392_v4 }
 0x1da   :  { %v4398_v7 = vpop.f32.mrf.mxu1  ;;  %v4400_v41 = vpop.f32.mrf.mxu0 }
 0x1dc   :  { %v1627_v30 = vpop.f32.mrf.mxu1  ;;  %v1740_v2 = vpop.f32.mrf.mxu0 }
 0x1dd   :  { %v1628_v22 = vadd.f32 %v1627_v30, %v4283_v29  ;;  %v1560_v30 = vadd.f32 %v4286_v21, %v4410_v62  ;;  %v1677_v21 = vadd.f32 %v4298_v32, %v1564_v58  ;;  %v1683_v58 = vadd.f32 %v4306_v51, %v1570_v46 }
 0x1de   :  { %v4403_v1 = vpop.f32.mrf.mxu1  ;;  %v4405_v34 = vpop.f32.mrf.mxu0  ;;  %v1580_v51 = vadd.f32 %v4325_v10, %v4410_v62 }
 0x1df   :  { %4726 = vst [vmem:[#allocation5_spill] sm:$0xff] %v4403_v1  ;;  %4727 = vst [vmem:[#allocation6_spill] sm:$0xff] %v4405_v34  ;;  %v4412_v28 = vadd.f32 %v1740_v2, %v1628_v22  ;;  %v1562_v34 = vadd.f32 %v4292_v9, %v4283_v29  ;;  %v1673_v38 = vadd.f32 %v4288_v11, %v1560_v30 }
 0x1e0   :  { %v4414_v3 = vpop.f32.mrf.mxu1  ;;  %v4416_v50 = vpop.f32.mrf.mxu0  ;;  %v1572_v11 = vadd.f32 %v4310_v36, %v4283_v29 }
 0x1e1   :  { %4728 = vst [vmem:[#allocation7_spill] sm:$0xff] %v4412_v28  ;;  %4729 = vst [vmem:[#allocation8_spill] sm:$0xff] %v4414_v3  ;;  %v1675_v28 = vadd.f32 %v4294_v45, %v1562_v34 }
 0x1e2   :  { %4730 = vst [vmem:[#allocation9_spill] sm:$0xff] %v4416_v50  ;;  %v4418_v13 = vpop.f32.mrf.mxu1  ;;  %v4420_v55 = vpop.f32.mrf.mxu0  ;;  %v1685_v43 = vadd.f32 %v4312_v60, %v1572_v11  ;;  %v1582_v60 = vadd.f32 %v4331_v61, %v4283_v29 }
 0x1e3   :  { %4731 = vst [vmem:[#allocation10_spill] sm:$0xff] %v4418_v13  ;;  %4732 = vst [vmem:[#allocation11_spill] sm:$0xff] %v4420_v55 }
 0x1e4   :  { %v1783_v54 = vpop.f32.mrf.mxu1  ;;  %v4426_v1 = vpop.f32.mrf.mxu0  ;;  %v1695_v10 = vadd.f32 %v4333_v18, %v1582_v60  ;;  %v1592_v18 = vadd.f32 %v4349_v42, %v4283_v29 }
 0x1e5   :  { %4733 = vst [vmem:[#allocation12_spill] sm:$0xff] %v4426_v1  ;;  %v1784_v3 = vadd.f32 %v1783_v54, %v4290_v15 }
 0x1e6   :  { %v1785_v2 = vpop.f32.mrf.mxu1  ;;  %v4430_v22 = vpop.f32.mrf.mxu0 }
 0x1e7   :  { %4734 = vst [vmem:[#allocation13_spill] sm:$0xff] %v4430_v22  ;;  %v1786_v13 = vadd.f32 %v1785_v2, %v1673_v38  ;;  %v1574_v38 = vadd.f32 %v4317_v63, %v4410_v62  ;;  %v2153_v54 = vmax.f32 %v1784_v3, 0.0 }
 0x1e8   :  { %v1787_v55 = vpop.f32.mrf.mxu1  ;;  %v4434_v50 = vpop.f32.mrf.mxu0 }
 0x1e9   :  { %v1788_v9 = vadd.f32 %v1787_v55, %v1675_v28  ;;  %v2154_v55 = vmax.f32 %v1786_v13, 0.0 }
 0x1ea   :  { %v1789_v1 = vpop.f32.mrf.mxu1  ;;  %v4438_v4 = vpop.f32.mrf.mxu0 }
 0x1eb   :  { %4735 = vst [vmem:[#allocation14_spill] sm:$0xff] %v4438_v4  ;;  %v1790_v30 = vadd.f32 %v1789_v1, %v1677_v21  ;;  %v2156_v45 = vmax.f32 %v1788_v9, 0.0  ;;  %v1687_v9 = vadd.f32 %v4319_v5, %v1574_v38  ;;  %v1584_v5 = vadd.f32 %v4338_v53, %v4410_v62 }
 0x1ec   :  { %v1793_v34 = vpop.f32.mrf.mxu1  ;;  %v4444_v22 = vpop.f32.mrf.mxu0 }
 0x1ed   :  { %4736 = vst [vmem:[#allocation15_spill] sm:$0xff] %v4444_v22  ;;  %v2157_v32 = vmax.f32 %v1790_v30, 0.0  ;;  %v2201_v36 = vpack.c.bf16 %v2156_v45, %v2153_v54  ;;  %v1794_v63 = vadd.f32 %v1793_v34, %v4308_v52  ;;  %v1693_v54 = vadd.f32 %v4327_v37, %v1580_v51 }
 0x1ee   :  { %v1795_v15 = vpop.f32.mrf.mxu1  ;;  %v4448_v28 = vpop.f32.mrf.mxu0  ;;  %v1590_v37 = vadd.f32 %v4343_v24, %v4410_v62  ;;  %v1705_v24 = vadd.f32 %v4351_v26, %v1592_v18  ;;  %v1602_v26 = vadd.f32 %v4364_v12, %v4283_v29 }
 0x1ef   :  { %v2202_v2 = vpack.c.bf16 %v2157_v32, %v2154_v55  ;;  %v1796_v22 = vadd.f32 %v1795_v15, %v1683_v58  ;;  %v2159_v34 = vmax.f32 %v1794_v63, 0.0 }
 0x1f0   :  { %v1797_v1 = vpop.f32.mrf.mxu1  ;;  %v4452_v21 = vpop.f32.mrf.mxu0 }
 0x1f1   :  { %v1798_v4 = vadd.f32 %v1797_v1, %v1685_v43  ;;  %2449 = vmatprep.mubr.bf16.mxu1 %v2202_v2  ;;  %v2160_v38 = vmax.f32 %v1796_v22, 0.0  ;;  %v1697_v43 = vadd.f32 %v4340_v57, %v1584_v5  ;;  %v1594_v57 = vadd.f32 %v4353_v20, %v4410_v62 }
 0x1f2   :  { %v1799_v3 = vpop.f32.mrf.mxu1  ;;  %v4456_v13 = vpop.f32.mrf.mxu0  ;;  %2450 = vmatmul.mubr.bf16.vlgmr.msra.gmra.mxu1 %v2201_v36  ;;  %v1703_v5 = vadd.f32 %v4345_v31, %v1590_v37  ;;  %v1600_v31 = vadd.f32 %v4358_v33, %v4410_v62  ;;  %v1715_v33 = vadd.f32 %v4366_v16, %v1602_v26  ;;  %v1612_v16 = vadd.f32 %v4379_v19, %v4283_v29 }
 0x1f3   :  { %v1800_v46 = vadd.f32 %v1799_v3, %v1687_v9  ;;  %v2162_v11 = vmax.f32 %v1798_v4, 0.0 }
 0x1f4   :  { %v1803_v30 = vpop.f32.mrf.mxu1  ;;  %v4462_v45 = vpop.f32.mrf.mxu0 }
 0x1f5   :  { %v2163_v52 = vmax.f32 %v1800_v46, 0.0  ;;  %v2204_v61 = vpack.c.bf16 %v2162_v11, %v2159_v34  ;;  %v1804_v53 = vadd.f32 %v1803_v30, %v4329_v0 }
 0x1f6   :  { %v1805_v55 = vpop.f32.mrf.mxu1  ;;  %v4466_v32 = vpop.f32.mrf.mxu0 }
 0x1f7   :  { %v2205_v15 = vpack.c.bf16 %v2163_v52, %v2160_v38  ;;  %v1806_v2 = vadd.f32 %v1805_v55, %v1693_v54  ;;  %v2165_v46 = vmax.f32 %v1804_v53, 0.0  ;;  %v1707_v55 = vadd.f32 %v4355_v23, %v1594_v57 }
 0x1f8   :  { %v1807_v58 = vpop.f32.mrf.mxu1  ;;  %v4470_v4 = vpop.f32.mrf.mxu0  ;;  %v1604_v23 = vadd.f32 %v4368_v8, %v4410_v62 }
 0x1f9   :  { %v1808_v36 = vadd.f32 %v1807_v58, %v1695_v10  ;;  %2457 = vmatprep.mubr.bf16.mxu1 %v2205_v15  ;;  %v2166_v60 = vmax.f32 %v1806_v2, 0.0 }
 0x1fa   :  { %v1809_v22 = vpop.f32.mrf.mxu1  ;;  %v4474_v1 = vpop.f32.mrf.mxu0  ;;  %2458 = vmatmul.mubr.bf16.gmra.mxu1 %v2204_v61 }
 0x1fb   :  { %v1810_v9 = vadd.f32 %v1809_v22, %v1697_v43  ;;  %v2168_v63 = vmax.f32 %v1808_v36, 0.0 }
 0x1fc   :  { %v1813_v3 = vpop.f32.mrf.mxu1  ;;  %v4480_v51 = vpop.f32.mrf.mxu0 }
 0x1fd   :  { %v2169_v0 = vmax.f32 %v1810_v9, 0.0  ;;  %v2207_v42 = vpack.c.bf16 %v2168_v63, %v2165_v46  ;;  %v1814_v20 = vadd.f32 %v1813_v3, %v4347_v35  ;;  %v1713_v9 = vadd.f32 %v4360_v27, %v1600_v31 }
 0x1fe   :  { %v1815_v11 = vpop.f32.mrf.mxu1  ;;  %v4484_v30 = vpop.f32.mrf.mxu0  ;;  %v1610_v27 = vadd.f32 %v4373_v48, %v4410_v62  ;;  %v1725_v48 = vadd.f32 %v4381_v25, %v1612_v16  ;;  %v1622_v25 = vadd.f32 %v4394_v47, %v4283_v29 }
 0x1ff   :  { %v2208_v38 = vpack.c.bf16 %v2169_v0, %v2166_v60  ;;  %v1816_v54 = vadd.f32 %v1815_v11, %v1703_v5  ;;  %v2171_v22 = vmax.f32 %v1814_v20, 0.0  ;;  %v1717_v60 = vadd.f32 %v4370_v56, %v1604_v23 }
 0x200   :  { %v1817_v52 = vpop.f32.mrf.mxu1  ;;  %v4488_v34 = vpop.f32.mrf.mxu0  ;;  %v1614_v56 = vadd.f32 %v4383_v59, %v4410_v62 }
 0x201   :  { %v1818_v10 = vadd.f32 %v1817_v52, %v1705_v24  ;;  %2465 = vmatprep.mubr.bf16.mxu1 %v2208_v38  ;;  %v2172_v53 = vmax.f32 %v1816_v54, 0.0 }
 0x202   :  { %v1819_v15 = vpop.f32.mrf.mxu1  ;;  %v4492_v61 = vpop.f32.mrf.mxu0  ;;  %2466 = vmatmul.mubr.bf16.gmra.mxu1 %v2207_v42 }
 0x203   :  { %v1820_v58 = vadd.f32 %v1819_v15, %v1707_v55  ;;  %v2174_v43 = vmax.f32 %v1818_v10, 0.0  ;;  %v1723_v15 = vadd.f32 %v4375_v44, %v1610_v27  ;;  %v1620_v44 = vadd.f32 %v4388_v6, %v4410_v62 }
 0x204   :  { %v1823_v2 = vpop.f32.mrf.mxu1  ;;  %v4498_v36 = vpop.f32.mrf.mxu0  ;;  %v1735_v6 = vadd.f32 %v4396_v17, %v1622_v25  ;;  %v4739_v17 = vld [vmem:[#allocation8_spill] sm:$0xff] }
 0x205   :  { %v2175_v35 = vmax.f32 %v1820_v58, 0.0  ;;  %v2210_v12 = vpack.c.bf16 %v2174_v43, %v2171_v22  ;;  %v1824_v8 = vadd.f32 %v1823_v2, %v4362_v14  ;;  %v1727_v43 = vadd.f32 %v4385_v49, %v1614_v56 }
 0x206   :  { %v1825_v37 = vpop.f32.mrf.mxu1  ;;  %v4502_v18 = vpop.f32.mrf.mxu0  ;;  %v1624_v49 = vadd.f32 %v4398_v7, %v4410_v62  ;;  %v4737_v7 = vld [vmem:[#allocation4_spill] sm:$0xff] }
 0x207   :  { %v2211_v63 = vpack.c.bf16 %v2175_v35, %v2172_v53  ;;  %v1826_v0 = vadd.f32 %v1825_v37, %v1713_v9  ;;  %v2177_v54 = vmax.f32 %v1824_v8, 0.0 }
 0x208   :  { %v1827_v3 = vpop.f32.mrf.mxu1  ;;  %v4506_v57 = vpop.f32.mrf.mxu0  ;;  %v1737_v27 = vadd.f32 %v4400_v41, %v1624_v49  ;;  %v4740_v41 = vld [vmem:[#allocation10_spill] sm:$0xff]  ;;  %v4743_v49 = vld [vmem:[#allocation11_spill] sm:$0xff] }
 0x209   :  { %v1828_v46 = vadd.f32 %v1827_v3, %v1715_v33  ;;  %2473 = vmatprep.mubr.bf16.mxu1 %v2211_v63  ;;  %v2178_v55 = vmax.f32 %v1826_v0, 0.0  ;;  %v1733_v0 = vadd.f32 %v4390_v40, %v1620_v44  ;;  %v4738_v40 = vld [vmem:[#allocation5_spill] sm:$0xff] }
 0x20a   :  { %v1829_v11 = vpop.f32.mrf.mxu1  ;;  %v4510_v5 = vpop.f32.mrf.mxu0  ;;  %2474 = vmatmul.mubr.bf16.gmra.mxu1 %v2210_v12  ;;  %v4742_v44 = vld [vmem:[#allocation9_spill] sm:$0xff] }
 0x20b   :  { %v1830_v24 = vadd.f32 %v1829_v11, %v1717_v60  ;;  %v2180_v38 = vmax.f32 %v1828_v46, 0.0 }
 0x20c   :  { %v1833_v42 = vpop.f32.mrf.mxu1  ;;  %v4516_v52 = vpop.f32.mrf.mxu0 }
 0x20d   :  { %v2181_v14 = vmax.f32 %v1830_v24, 0.0  ;;  %v2213_v19 = vpack.c.bf16 %v2180_v38, %v2177_v54  ;;  %v1834_v59 = vadd.f32 %v1833_v42, %v4377_v39 }
 0x20e   :  { %v1835_v10 = vpop.f32.mrf.mxu1  ;;  %v4520_v20 = vpop.f32.mrf.mxu0 }
 0x20f   :  { %v2214_v31 = vpack.c.bf16 %v2181_v14, %v2178_v55  ;;  %v1836_v2 = vadd.f32 %v1835_v10, %v1723_v15  ;;  %v2183_v12 = vmax.f32 %v1834_v59, 0.0  ;;  %v1630_v55 = vadd.f32 %v4738_v40, %v4410_v62  ;;  %v4741_v59 = vld [vmem:[#allocation6_spill] sm:$0xff] }
 0x210   :  { %v1837_v26 = vpop.f32.mrf.mxu1  ;;  %v4524_v58 = vpop.f32.mrf.mxu0  ;;  %v1632_v14 = vadd.f32 %v4739_v17, %v4283_v29 }
 0x211   :  { %v1838_v23 = vadd.f32 %v1837_v26, %v1725_v48  ;;  %2481 = vmatprep.mubr.bf16.mxu1 %v2214_v31  ;;  %v2184_v63 = vmax.f32 %v1836_v2, 0.0  ;;  %v1634_v31 = vadd.f32 %v4740_v41, %v4410_v62  ;;  %v4744_v62 = vld [vmem:[#allocation7_spill] sm:$0xff] }
 0x212   :  { %v1839_v53 = vpop.f32.mrf.mxu1  ;;  %v4528_v35 = vpop.f32.mrf.mxu0  ;;  %2482 = vmatmul.mubr.bf16.gmra.mxu1 %v2213_v19  ;;  %v1745_v25 = vadd.f32 %v4742_v44, %v1632_v14 }
 0x213   :  { %v1840_v22 = vadd.f32 %v1839_v53, %v1727_v43  ;;  %v2186_v37 = vmax.f32 %v1838_v23, 0.0  ;;  %v1743_v53 = vadd.f32 %v4741_v59, %v1630_v55 }
 0x214   :  { %v1843_v9 = vpop.f32.mrf.mxu1  ;;  %v4534_v33 = vpop.f32.mrf.mxu0 }
 0x215   :  { %v2187_v39 = vmax.f32 %v1840_v22, 0.0  ;;  %v2216_v47 = vpack.c.bf16 %v2186_v37, %v2183_v12  ;;  %v1844_v38 = vadd.f32 %v1843_v9, %v4737_v7 }
 0x216   :  { %v1845_v3 = vpop.f32.mrf.mxu1  ;;  %v4538_v60 = vpop.f32.mrf.mxu0 }
 0x217   :  { %v2217_v46 = vpack.c.bf16 %v2187_v39, %v2184_v63  ;;  %v1846_v16 = vadd.f32 %v1845_v3, %v1733_v0  ;;  %v2189_v43 = vmax.f32 %v1844_v38, 0.0  ;;  %v1747_v63 = vadd.f32 %v4743_v49, %v1634_v31  ;;  %v4750_v31 = vld [vmem:[#allocation14_spill] sm:$0xff] }
 0x218   :  { %v1847_v8 = vpop.f32.mrf.mxu1  ;;  %v4542_v11 = vpop.f32.mrf.mxu0 }
 0x219   :  { %v1848_v24 = vadd.f32 %v1847_v8, %v1735_v6  ;;  %2489 = vmatprep.mubr.bf16.mxu1 %v2217_v46  ;;  %v2190_v19 = vmax.f32 %v1846_v16, 0.0  ;;  %v4745_v46 = vld [vmem:[#allocation2_spill] sm:$0xff]  ;;  %v4747_v8 = vld [vmem:[#allocation3_spill] sm:$0xff]  ;;  %v4748_v16 = vld [vmem:[#allocation12_spill] sm:$0xff] }
 0x21a   :  { %v1849_v42 = vpop.f32.mrf.mxu1  ;;  %v4546_v56 = vpop.f32.mrf.mxu0  ;;  %2490 = vmatmul.mubr.bf16.gmra.mxu1 %v2216_v47  ;;  %v4746_v47 = vsub.s32 2, %v4745_v46 }
 0x21b   :  { %v1850_v54 = vadd.f32 %v1849_v42, %v1737_v27  ;;  %v2192_v10 = vmax.f32 %v1848_v24, 0.0  ;;  %v4749_v24 = vld [vmem:[#allocation13_spill] sm:$0xff] }
 0x21c   :  { %v1853_v15 = vpop.f32.mrf.mxu1  ;;  %v4552_v48 = vpop.f32.mrf.mxu0  ;;  %v4569_v27 = vrot.slane %v4747_v8, %v4746_v47  ;;  %v2861_v7 = vadd.f32 %v4749_v24, %v4748_v16 }
 0x21d   :  { %v2193_v26 = vmax.f32 %v1850_v54, 0.0  ;;  %v2219_v29 = vpack.c.bf16 %v2192_v10, %v2189_v43  ;;  %v1854_v3 = vadd.f32 %v1853_v15, %v4744_v62 }
 0x21e   :  { %v1855_v2 = vpop.f32.mrf.mxu1  ;;  %v4556_v23 = vpop.f32.mrf.mxu0  ;;  %v1897_v41 = vadd.f32 %v2861_v7, %v4569_v27 }
 0x21f   :  { %v2220_v22 = vpack.c.bf16 %v2193_v26, %v2190_v19  ;;  %v1856_v39 = vadd.f32 %v1855_v2, %v1743_v53  ;;  %v2195_v54 = vmax.f32 %v1854_v3, 0.0  ;;  %v2864_v19 = vadd.f32 %v4750_v31, %v4434_v50 }
 0x220   :  { %v1857_v37 = vpop.f32.mrf.mxu1  ;;  %v4560_v9 = vpop.f32.mrf.mxu0  ;;  %v2876_v31 = vadd.f32 %v4474_v1, %v4470_v4 }
 0x221   :  { %v1858_v12 = vadd.f32 %v1857_v37, %v1745_v25  ;;  %2497 = vmatprep.mubr.bf16.mxu1 %v2220_v22  ;;  %v2196_v17 = vmax.f32 %v1856_v39, 0.0  ;;  %v1900_v22 = vadd.f32 %v2864_v19, %v4569_v27 }
 0x222   :  { %v1859_v0 = vpop.f32.mrf.mxu1  ;;  %v4564_v6 = vpop.f32.mrf.mxu0  ;;  %2498 = vmatmul.mubr.bf16.gmra.mxu1 %v2219_v29  ;;  %v4751_v29 = vld [vmem:[#allocation15_spill] sm:$0xff] }
 0x223   :  { %v1860_v38 = vadd.f32 %v1859_v0, %v1747_v63  ;;  %v2198_v42 = vmax.f32 %v1858_v12, 0.0  ;;  %v2867_v37 = vadd.f32 %v4448_v28, %v4751_v29  ;;  %v2870_v0 = vadd.f32 %v4456_v13, %v4452_v21 }
 0x224   :  { %v2923_v40 = vpop.f32.mrf.mxu1  ;;  %v3107_v55 = vpop.f32.mrf.mxu0 }
 0x225   :  { %v2199_v14 = vmax.f32 %v1860_v38, 0.0  ;;  %v2222_v2 = vpack.c.bf16 %v2198_v42, %v2195_v54  ;;  %v1905_v3 = vadd.f32 %v2867_v37, %v4569_v27  ;;  %v1908_v28 = vadd.f32 %v2870_v0, %v4569_v27 }
 0x226   :  { %v2924_v10 = vpop.f32.mrf.mxu1  ;;  %v2090_v15 = vpop.f32.mrf.mxu0 }
 0x227   :  { %v2223_v26 = vpack.c.bf16 %v2199_v14, %v2196_v17  ;;  %v2925_v43 = vadd.f32 %v2924_v10, %v2923_v40  ;;  %v2873_v40 = vadd.f32 %v4466_v32, %v4462_v45 }
 0x228   :  { %v2926_v59 = vpop.f32.mrf.mxu1  ;;  %v3108_v44 = vpop.f32.mrf.mxu0 }
 0x229   :  { %v1994_v53 = vadd.f32 %v2925_v43, %v1897_v41  ;;  %2505 = vmatprep.mubr.bf16.mxu1 %v2223_v26  ;;  %v1913_v41 = vadd.f32 %v2873_v40, %v4569_v27 }
 0x22a   :  { %v2927_v25 = vpop.f32.mrf.mxu1  ;;  %2506 = vmatmul.mubr.bf16.gmra.mxu1 %v2222_v2  ;;  %v2093_v62 = vpop.f32.mrf.mxu0 }
 0x22b   :  { %v2928_v49 = vadd.f32 %v2927_v25, %v2926_v59  ;;  %v2091_v39 = vadd.f32 %v2090_v15, %v1994_v53  ;;  %v2879_v25 = vadd.f32 %v4484_v30, %v4480_v51 }
 0x22c   :  { %v2929_v63 = vpop.f32.mrf.mxu1  ;;  %v3111_v38 = vpop.f32.mrf.mxu0 }
 0x22d   :  { %v1997_v12 = vadd.f32 %v2928_v49, %v1900_v22  ;;  %v2155_v16 = vmax.f32 %v2091_v39, 0.0  ;;  %v2882_v39 = vadd.f32 %v4492_v61, %v4488_v34 }
 0x22e   :  { %v2930_v50 = vpop.f32.mrf.mxu1  ;;  %v2106_v21 = vpop.f32.mrf.mxu0 }
 0x22f   :  { %v2094_v46 = vadd.f32 %v2093_v62, %v1997_v12  ;;  %v2931_v47 = vadd.f32 %v2930_v50, %v2929_v63 }
 0x230   :  { %v2932_v8 = vpop.f32.mrf.mxu1  ;;  %v3112_v32 = vpop.f32.mrf.mxu0 }
 0x231   :  { %v2158_v24 = vmax.f32 %v2094_v46, 0.0  ;;  %v2002_v7 = vadd.f32 %v2931_v47, %v1905_v3  ;;  %v1924_v47 = vadd.f32 %v2882_v39, %v4569_v27 }
 0x232   :  { %v2933_v42 = vpop.f32.mrf.mxu1  ;;  %v2109_v4 = vpop.f32.mrf.mxu0 }
 0x233   :  { %v2203_v17 = vpack.c.bf16 %v2158_v24, %v2155_v16  ;;  %v2934_v14 = vadd.f32 %v2933_v42, %v2932_v8  ;;  %v2099_v10 = vadd.f32 %v3107_v55, %v2002_v7  ;;  %v1916_v55 = vadd.f32 %v2876_v31, %v4569_v27 }
 0x234   :  { %v2935_v54 = vpop.f32.mrf.mxu1  ;;  %v3115_v30 = vpop.f32.mrf.mxu0  ;;  %v2885_v8 = vadd.f32 %v4502_v18, %v4498_v36 }
 0x235   :  { %v2005_v15 = vadd.f32 %v2934_v14, %v1908_v28  ;;  %3129 = vmatprep.mubr.msk.bf16.mxu0 %vm2392_vm1, %v2203_v17  ;;  %v2161_v2 = vmax.f32 %v2099_v10, 0.0  ;;  %v2888_v17 = vadd.f32 %v4510_v5, %v4506_v57 }
 0x236   :  { %v2936_v13 = vpop.f32.mrf.mxu1  ;;  %v2122_v34 = vpop.f32.mrf.mxu0  ;;  %v1929_v40 = vadd.f32 %v2885_v8, %v4569_v27  ;;  %v2903_v8 = vadd.f32 %v4556_v23, %v4552_v48 }
 0x237   :  { %v2102_v19 = vadd.f32 %v3108_v44, %v2005_v15  ;;  %v2937_v26 = vadd.f32 %v2936_v13, %v2935_v54  ;;  %v1921_v44 = vadd.f32 %v2879_v25, %v4569_v27 }
 0x238   :  { %v2938_v43 = vpop.f32.mrf.mxu1  ;;  %v3116_v18 = vpop.f32.mrf.mxu0 }
 0x239   :  { %v2164_v59 = vmax.f32 %v2102_v19, 0.0  ;;  %v2010_v45 = vadd.f32 %v2937_v26, %v1913_v41  ;;  %v2891_v41 = vadd.f32 %v4520_v20, %v4516_v52 }
 0x23a   :  { %v2939_v53 = vpop.f32.mrf.mxu1  ;;  %v2125_v57 = vpop.f32.mrf.mxu0 }
 0x23b   :  { %v2206_v22 = vpack.c.bf16 %v2164_v59, %v2161_v2  ;;  %v2940_v29 = vadd.f32 %v2939_v53, %v2938_v43  ;;  %v2107_v49 = vadd.f32 %v2106_v21, %v2010_v45  ;;  %v1937_v59 = vadd.f32 %v2891_v41, %v4569_v27 }
 0x23c   :  { %v2941_v37 = vpop.f32.mrf.mxu1  ;;  %v2894_v45 = vadd.f32 %v4528_v35, %v4524_v58  ;;  %v3119_v20 = vpop.f32.mrf.mxu0 }
 0x23d   :  { %v2013_v63 = vadd.f32 %v2940_v29, %v1916_v55  ;;  %3130 = vmatmul.mubr.msk.bf16.vlgmr.msra.gmra.mxu0 %vm2392_vm1, %v2206_v22  ;;  %v2167_v3 = vmax.f32 %v2107_v49, 0.0  ;;  %v2897_v49 = vadd.f32 %v4538_v60, %v4534_v33 }
 0x23e   :  { %v2942_v1 = vpop.f32.mrf.mxu1  ;;  %v2138_v58 = vpop.f32.mrf.mxu0 }
 0x23f   :  { %v2110_v12 = vadd.f32 %v2109_v4, %v2013_v63  ;;  %v2943_v62 = vadd.f32 %v2942_v1, %v2941_v37  ;;  %v1940_v37 = vadd.f32 %v2894_v45, %v4569_v27 }
 0x240   :  { %v2944_v50 = vpop.f32.mrf.mxu1  ;;  %v3120_v60 = vpop.f32.mrf.mxu0 }
 0x241   :  { %v2170_v0 = vmax.f32 %v2110_v12, 0.0  ;;  %v2018_v51 = vadd.f32 %v2943_v62, %v1921_v44  ;;  %v1945_v12 = vadd.f32 %v2897_v49, %v4569_v27  ;;  %v2900_v62 = vadd.f32 %v4546_v56, %v4542_v11 }
 0x242   :  { %v2945_v46 = vpop.f32.mrf.mxu1  ;;  %v2141_v11 = vpop.f32.mrf.mxu0 }
 0x243   :  { %v2209_v16 = vpack.c.bf16 %v2170_v0, %v2167_v3  ;;  %v2946_v24 = vadd.f32 %v2945_v46, %v2944_v50  ;;  %v2115_v42 = vadd.f32 %v3111_v38, %v2018_v51  ;;  %v1932_v38 = vadd.f32 %v2888_v17, %v4569_v27 }
 0x244   :  { %v2947_v7 = vpop.f32.mrf.mxu1 }
 0x245   :  { %v2021_v28 = vadd.f32 %v2946_v24, %v1924_v47  ;;  %3133 = vmatprep.mubr.msk.bf16.mxu0 %vm2392_vm1, %v2209_v16  ;;  %v2173_v15 = vmax.f32 %v2115_v42, 0.0 }
 0x246   :  { %v2948_v61 = vpop.f32.mrf.mxu1 }
 0x247   :  { %v2118_v14 = vadd.f32 %v3112_v32, %v2021_v28  ;;  %v2949_v54 = vadd.f32 %v2948_v61, %v2947_v7  ;;  %v2906_v61 = vadd.f32 %v4564_v6, %v4560_v9 }
 0x248   :  { %v2950_v10 = vpop.f32.mrf.mxu1 }
 0x249   :  { %v2176_v21 = vmax.f32 %v2118_v14, 0.0  ;;  %v2026_v36 = vadd.f32 %v2949_v54, %v1929_v40 }
 0x24a   :  { %v2951_v13 = vpop.f32.mrf.mxu1 }
 0x24b   :  { %v2212_v31 = vpack.c.bf16 %v2176_v21, %v2173_v15  ;;  %v2952_v19 = vadd.f32 %v2951_v13, %v2950_v10  ;;  %v2123_v43 = vadd.f32 %v2122_v34, %v2026_v36  ;;  %v1953_v34 = vadd.f32 %v2903_v8, %v4569_v27 }
 0x24c   :  { %v2953_v26 = vpop.f32.mrf.mxu1  ;;  %v1956_v15 = vadd.f32 %v2906_v61, %v4569_v27 }
 0x24d   :  { %v2029_v2 = vadd.f32 %v2952_v19, %v1932_v38  ;;  %3134 = vmatmul.mubr.msk.bf16.gmra.mxu0 %vm2392_vm1, %v2212_v31  ;;  %v2179_v25 = vmax.f32 %v2123_v43, 0.0 }
 0x24e   :  { %v2954_v5 = vpop.f32.mrf.mxu1 }
 0x24f   :  { %v2126_v32 = vadd.f32 %v2125_v57, %v2029_v2  ;;  %v2955_v53 = vadd.f32 %v2954_v5, %v2953_v26 }
 0x250   :  { %v2956_v55 = vpop.f32.mrf.mxu1 }
 0x251   :  { %v2182_v22 = vmax.f32 %v2126_v32, 0.0  ;;  %v2034_v52 = vadd.f32 %v2955_v53, %v1937_v59 }
 0x252   :  { %v2957_v29 = vpop.f32.mrf.mxu1 }
 0x253   :  { %v2215_v63 = vpack.c.bf16 %v2182_v22, %v2179_v25  ;;  %v2958_v4 = vadd.f32 %v2957_v29, %v2956_v55  ;;  %v2131_v44 = vadd.f32 %v3115_v30, %v2034_v52  ;;  %v1948_v30 = vadd.f32 %v2900_v62, %v4569_v27 }
 0x254   :  { %v2959_v1 = vpop.f32.mrf.mxu1 }
 0x255   :  { %v2037_v39 = vadd.f32 %v2958_v4, %v1940_v37  ;;  %3137 = vmatprep.mubr.msk.bf16.mxu0 %vm2392_vm1, %v2215_v63  ;;  %v2185_v51 = vmax.f32 %v2131_v44, 0.0 }
 0x256   :  { %v2960_v35 = vpop.f32.mrf.mxu1 }
 0x257   :  { %v2134_v50 = vadd.f32 %v3116_v18, %v2037_v39  ;;  %v2961_v3 = vadd.f32 %v2960_v35, %v2959_v1  ;;  %v4630_v1 = vld [vmem:[%s4718_s6] ss:$0 sm:$0xff] }
 0x258   :  { %v2962_v0 = vpop.f32.mrf.mxu1 }
 0x259   :  { %v2188_v46 = vmax.f32 %v2134_v50, 0.0  ;;  %v2042_v33 = vadd.f32 %v2961_v3, %v1945_v12 }
 0x25a   :  { %v2963_v47 = vpop.f32.mrf.mxu1 }
 0x25b   :  { %v2218_v16 = vpack.c.bf16 %v2188_v46, %v2185_v51  ;;  %v2964_v24 = vadd.f32 %v2963_v47, %v2962_v0  ;;  %v2139_v42 = vadd.f32 %v2138_v58, %v2042_v33 }
 0x25c   :  { %v2965_v7 = vpop.f32.mrf.mxu1 }
 0x25d   :  { %v2045_v28 = vadd.f32 %v2964_v24, %v1948_v30  ;;  %3138 = vmatmul.mubr.msk.bf16.gmra.mxu0 %vm2392_vm1, %v2218_v16  ;;  %v2191_v54 = vmax.f32 %v2139_v42, 0.0 }
 0x25e   :  { %v2966_v56 = vpop.f32.mrf.mxu1 }
 0x25f   :  { %v2142_v40 = vadd.f32 %v2141_v11, %v2045_v28  ;;  %v2967_v17 = vadd.f32 %v2966_v56, %v2965_v7 }
 0x260   :  { %v2968_v14 = vpop.f32.mrf.mxu1 }
 0x261   :  { %v2194_v10 = vmax.f32 %v2142_v40, 0.0  ;;  %v2050_v48 = vadd.f32 %v2967_v17, %v1953_v34 }
 0x262   :  { %v2969_v23 = vpop.f32.mrf.mxu1 }
 0x263   :  { %v2221_v21 = vpack.c.bf16 %v2194_v10, %v2191_v54  ;;  %v2970_v36 = vadd.f32 %v2969_v23, %v2968_v14  ;;  %v2147_v18 = vadd.f32 %v3119_v20, %v2050_v48 }
 0x265   :  { %v2053_v13 = vadd.f32 %v2970_v36, %v1956_v15  ;;  %3141 = vmatprep.mubr.msk.bf16.mxu0 %vm2392_vm1, %v2221_v21  ;;  %v2197_v41 = vmax.f32 %v2147_v18, 0.0 }
 0x267   :  { %v2150_v38 = vadd.f32 %v3120_v60, %v2053_v13 }
 0x269   :  { %v2200_v31 = vmax.f32 %v2150_v38, 0.0 }
 0x26b   :  { %v2224_v19 = vpack.c.bf16 %v2200_v31, %v2197_v41 }
 0x26d   :  { %3142 = vmatmul.mubr.msk.bf16.gmra.mxu0 %vm2392_vm1, %v2224_v19 }
 0x2b2   :  { %v3003_v9 = vpop.f32.mrf.mxu1 }
 0x2b4   :  { %v3004_v6 = vpop.f32.mrf.mxu1 }
 0x2b5   :  { %v3005_v4 = vadd.f32 %v3004_v6, %v3003_v9 }
 0x2b6   :  { %v3006_v26 = vpop.f32.mrf.mxu1 }
 0x2b7   :  { %v2452_v50 = vadd.f32 %v3005_v4, %v4630_v1 }
 0x2b8   :  { %v3007_v43 = vpop.f32.mrf.mxu1 }
 0x2b9   :  { %v3008_v12 = vadd.f32 %v3007_v43, %v3006_v26 }
 0x2ba   :  { %v3009_v2 = vpop.f32.mrf.mxu1 }
 0x2bb   :  { %v2455_v47 = vadd.f32 %v3008_v12, %v4630_v1 }
 0x2bc   :  { %v3010_v57 = vpop.f32.mrf.mxu1 }
 0x2bd   :  { %v3011_v49 = vadd.f32 %v3010_v57, %v3009_v2 }
 0x2be   :  { %v3012_v5 = vpop.f32.mrf.mxu1 }
 0x2bf   :  { %v2460_v39 = vadd.f32 %v3011_v49, %v4630_v1 }
 0x2c0   :  { %v3013_v27 = vpop.f32.mrf.mxu1 }
 0x2c1   :  { %v3014_v44 = vadd.f32 %v3013_v27, %v3012_v5 }
 0x2c2   :  { %v3015_v59 = vpop.f32.mrf.mxu1 }
 0x2c3   :  { %v2463_v51 = vadd.f32 %v3014_v44, %v4630_v1 }
 0x2c4   :  { %v3016_v45 = vpop.f32.mrf.mxu1 }
 0x2c5   :  { %v3017_v42 = vadd.f32 %v3016_v45, %v3015_v59 }
 0x2c6   :  { %v3018_v32 = vpop.f32.mrf.mxu1 }
 0x2c7   :  { %v2468_v17 = vadd.f32 %v3017_v42, %v4630_v1 }
 0x2c8   :  { %v3019_v53 = vpop.f32.mrf.mxu1 }
 0x2c9   :  { %v3020_v61 = vadd.f32 %v3019_v53, %v3018_v32 }
 0x2ca   :  { %v3021_v55 = vpop.f32.mrf.mxu1 }
 0x2cb   :  { %v2471_v21 = vadd.f32 %v3020_v61, %v4630_v1 }
 0x2cc   :  { %v3022_v25 = vpop.f32.mrf.mxu1 }
 0x2cd   :  { %v3023_v24 = vadd.f32 %v3022_v25, %v3021_v55 }
 0x2ce   :  { %v3024_v22 = vpop.f32.mrf.mxu1 }
 0x2cf   :  { %v2476_v11 = vadd.f32 %v3023_v24, %v4630_v1 }
 0x2d0   :  { %v3025_v52 = vpop.f32.mrf.mxu1 }
 0x2d1   :  { %v3026_v28 = vadd.f32 %v3025_v52, %v3024_v22 }
 0x2d2   :  { %v3027_v20 = vpop.f32.mrf.mxu1 }
 0x2d3   :  { %v2479_v10 = vadd.f32 %v3026_v28, %v4630_v1 }
 0x2d4   :  { %v3028_v29 = vpop.f32.mrf.mxu1 }
 0x2d5   :  { %v3029_v31 = vadd.f32 %v3028_v29, %v3027_v20 }
 0x2d6   :  { %v3030_v37 = vpop.f32.mrf.mxu1 }
 0x2d7   :  { %v2484_v57 = vadd.f32 %v3029_v31, %v4630_v1 }
 0x2d8   :  { %v3031_v63 = vpop.f32.mrf.mxu1 }
 0x2d9   :  { %v3032_v43 = vadd.f32 %v3031_v63, %v3030_v37 }
 0x2da   :  { %v3033_v58 = vpop.f32.mrf.mxu1 }
 0x2db   :  { %v2487_v55 = vadd.f32 %v3032_v43, %v4630_v1 }
 0x2dc   :  { %v3034_v46 = vpop.f32.mrf.mxu1 }
 0x2dd   :  { %v3035_v38 = vadd.f32 %v3034_v46, %v3033_v58 }
 0x2de   :  { %v3036_v16 = vpop.f32.mrf.mxu1 }
 0x2df   :  { %v2492_v9 = vadd.f32 %v3035_v38, %v4630_v1 }
 0x2e0   :  { %v3037_v7 = vpop.f32.mrf.mxu1 }
 0x2e1   :  { %v3038_v19 = vadd.f32 %v3037_v7, %v3036_v16 }
 0x2e2   :  { %v3039_v56 = vpop.f32.mrf.mxu1 }
 0x2e3   :  { %v2495_v59 = vadd.f32 %v3038_v19, %v4630_v1 }
 0x2e4   :  { %v3040_v48 = vpop.f32.mrf.mxu1 }
 0x2e5   :  { %v3041_v37 = vadd.f32 %v3040_v48, %v3039_v56 }
 0x2e6   :  { %v3042_v13 = vpop.f32.mrf.mxu1 }
 0x2e7   :  { %v2500_v58 = vadd.f32 %v3041_v37, %v4630_v1 }
 0x2e8   :  { %v3043_v41 = vpop.f32.mrf.mxu1 }
 0x2e9   :  { %v3044_v44 = vadd.f32 %v3043_v41, %v3042_v13 }
 0x2ea   :  { %v3045_v6 = vpop.f32.mrf.mxu1 }
 0x2ec   :  { %v3046_v45 = vpop.f32.mrf.mxu1 }
 0x2ed   :  { %v3047_v20 = vadd.f32 %v3046_v45, %v3045_v6 }
 0x2ee   :  { %v3048_v52 = vpop.f32.mrf.mxu1 }
 0x2ef   :  { %v2508_v63 = vadd.f32 %v3047_v20, %v4630_v1 }
 0x2f0   :  { %v3049_v29 = vpop.f32.mrf.mxu1 }
 0x2f1   :  { %v3050_v49 = vadd.f32 %v3049_v29, %v3048_v52 }
 0x2fd   :  { %v3131_v35 = vpop.f32.mrf.mxu0 }
 0x2fe   :  { %v2557_v62 = vadd.f32 %v3131_v35, %v2460_v39 }
 0x2ff   :  { %v2548_v3 = vpop.f32.mrf.mxu0 }
 0x300   :  { %2614 = vst.msk [vmem:[%s4719_s7 + $0x10] sm:$0xff] %vm2611_vm2, %v2557_v62  ;;  %v2549_v0 = vadd.f32 %v2548_v3, %v2452_v50  ;;  %v2511_v62 = vadd.f32 %v3050_v49, %v4630_v1 }
 0x301   :  { %v3132_v33 = vpop.f32.mrf.mxu0 }
 0x302   :  { %2612 = vst.msk [vmem:[%s4719_s7] sm:$0xff] %vm2611_vm2, %v2549_v0  ;;  %v2560_v60 = vadd.f32 %v3132_v33, %v2463_v51  ;;  %v2503_v0 = vadd.f32 %v3044_v44, %v4630_v1 }
 0x303   :  { %v2551_v30 = vpop.f32.mrf.mxu0 }
 0x304   :  { %2615 = vst.msk [vmem:[%s4719_s7 + $0x18] sm:$0xff] %vm2611_vm2, %v2560_v60  ;;  %v2552_v8 = vadd.f32 %v2551_v30, %v2455_v47 }
 0x306   :  { %2613 = vst.msk [vmem:[%s4719_s7 + $0x8] sm:$0xff] %vm2611_vm2, %v2552_v8 }
 0x30d   :  { %v3135_v34 = vpop.f32.mrf.mxu0 }
 0x30e   :  { %v2573_v40 = vadd.f32 %v3135_v34, %v2476_v11 }
 0x30f   :  { %v2564_v14 = vpop.f32.mrf.mxu0 }
 0x310   :  { %2618 = vst.msk [vmem:[%s4719_s7 + $0x30] sm:$0xff] %vm2611_vm2, %v2573_v40  ;;  %v2565_v54 = vadd.f32 %v2564_v14, %v2468_v17 }
 0x311   :  { %v3136_v23 = vpop.f32.mrf.mxu0 }
 0x312   :  { %2616 = vst.msk [vmem:[%s4719_s7 + $0x20] sm:$0xff] %vm2611_vm2, %v2565_v54  ;;  %v2576_v15 = vadd.f32 %v3136_v23, %v2479_v10 }
 0x313   :  { %v2567_v36 = vpop.f32.mrf.mxu0 }
 0x314   :  { %2619 = vst.msk [vmem:[%s4719_s7 + $0x38] sm:$0xff] %vm2611_vm2, %v2576_v15  ;;  %v2568_v18 = vadd.f32 %v2567_v36, %v2471_v21 }
 0x316   :  { %2617 = vst.msk [vmem:[%s4719_s7 + $0x28] sm:$0xff] %vm2611_vm2, %v2568_v18 }
 0x31d   :  { %v3139_v26 = vpop.f32.mrf.mxu0 }
 0x31e   :  { %v2589_v2 = vadd.f32 %v3139_v26, %v2492_v9 }
 0x31f   :  { %v2580_v5 = vpop.f32.mrf.mxu0 }
 0x320   :  { %2622 = vst.msk [vmem:[%s4719_s7 + $0x50] sm:$0xff] %vm2611_vm2, %v2589_v2  ;;  %v2581_v27 = vadd.f32 %v2580_v5, %v2484_v57 }
 0x321   :  { %v3140_v32 = vpop.f32.mrf.mxu0 }
 0x322   :  { %2620 = vst.msk [vmem:[%s4719_s7 + $0x40] sm:$0xff] %vm2611_vm2, %v2581_v27  ;;  %v2592_v53 = vadd.f32 %v3140_v32, %v2495_v59 }
 0x323   :  { %v2583_v25 = vpop.f32.mrf.mxu0 }
 0x324   :  { %2623 = vst.msk [vmem:[%s4719_s7 + $0x58] sm:$0xff] %vm2611_vm2, %v2592_v53  ;;  %v2584_v22 = vadd.f32 %v2583_v25, %v2487_v55 }
 0x326   :  { %2621 = vst.msk [vmem:[%s4719_s7 + $0x48] sm:$0xff] %vm2611_vm2, %v2584_v22 }
 0x32d   :  { %v3143_v4 = vpop.f32.mrf.mxu0 }
 0x32e   :  { %v2605_v39 = vadd.f32 %v3143_v4, %v2508_v63 }
 0x32f   :  { %v2596_v35 = vpop.f32.mrf.mxu0 }
 0x330   :  { %2626 = vst.msk [vmem:[%s4719_s7 + $0x70] sm:$0xff] %vm2611_vm2, %v2605_v39  ;;  %v2597_v12 = vadd.f32 %v2596_v35, %v2500_v58 }
 0x331   :  { %v3144_v50 = vpop.f32.mrf.mxu0 }
 0x332   :  { %2624 = vst.msk [vmem:[%s4719_s7 + $0x60] sm:$0xff] %vm2611_vm2, %v2597_v12  ;;  %v2608_v3 = vadd.f32 %v3144_v50, %v2511_v62 }
 0x333   :  { %v2599_v51 = vpop.f32.mrf.mxu0 }
 0x334   :  { %2627 = vst.msk [vmem:[%s4719_s7 + $0x78] sm:$0xff] %vm2611_vm2, %v2608_v3  ;;  %v2600_v46 = vadd.f32 %v2599_v51, %v2503_v0 }
 0x336   :  { %2625 = vst.msk [vmem:[%s4719_s7 + $0x68] sm:$0xff] %vm2611_vm2, %v2600_v46 }

</bundles_post_ra>
